<compile_context>
chip_gen: v5e
topology: v5e:2x2
jax: 0.10.0
libtpu: 0.0.40
codegen_flags: <defaults>
</compile_context>

<pallas_src>
import functools

import jax
import jax.numpy as jnp
from jax.experimental import pallas as pl
from jax.experimental.pallas import tpu as pltpu

LANE = 128   # lane width == per-chunk cumsum length (fixed tri constant)
SB = 16      # 128-wide chunks per class per grid step (power of 2, multiple of 16)


def _lovasz_kernel(gts_ref, err_ref, fg_ref, out_ref, carry_ref, acc_ref, *,
                   present_only: bool):
    # err_ref: [C, SB, LANE] f32  sorted errors (descending per class, 0-padded)
    # fg_ref : [C, SB, LANE] bf16 sorted 0/1 ground-truth indicator
    # gts_ref: [C*SB, 1]     f32  total fg count of each row's class
    i = pl.program_id(0)
    n = pl.num_programs(0)
    C, sb, L = err_ref.shape
    R = C * sb
    sb_shift = sb.bit_length() - 1  # sb is a power of two

    @pl.when(i == 0)
    def _init():
        carry_ref[...] = jnp.zeros_like(carry_ref)
        acc_ref[...] = jnp.zeros_like(acc_ref)

    err = err_ref[...].reshape(R, L)             # f32  (layout no-op: sb % 8 == 0)
    fg_bf = fg_ref[...].reshape(R, L)            # bf16 (layout no-op: sb % 16 == 0)
    fg = fg_bf.astype(jnp.float32)
    gts = gts_ref[...]                           # [R, 1]

    # --- tiny constants, rebuilt per step (VPU-cheap) ---
    li = jax.lax.broadcasted_iota(jnp.int32, (L, L), 0)
    lj = jax.lax.broadcasted_iota(jnp.int32, (L, L), 1)
    tri = (li <= lj).astype(jnp.bfloat16)        # inclusive upper-tri [L, L]

    ri = jax.lax.broadcasted_iota(jnp.int32, (R, R), 0)
    rj = jax.lax.broadcasted_iota(jnp.int32, (R, R), 1)
    same_class = (ri >> sb_shift) == (rj >> sb_shift)
    strictly_before = same_class & ((rj & (sb - 1)) < (ri & (sb - 1)))
    a_same = same_class.astype(jnp.bfloat16)     # [R, R]
    a_before = strictly_before.astype(jnp.bfloat16)

    # --- blocked cumsum of fg along the sorted pixel axis (MXU, bf16 in / f32 acc) ---
    cum_local = jnp.dot(fg_bf, tri, preferred_element_type=jnp.float32)        # [R, L]
    pre_rows = jnp.sum(jnp.dot(a_before, fg_bf, preferred_element_type=jnp.float32),
                       axis=1, keepdims=True)                                  # [R, 1]
    blk_class_sum = jnp.sum(jnp.dot(a_same, fg_bf, preferred_element_type=jnp.float32),
                            axis=1, keepdims=True)                             # [R, 1]

    carry = carry_ref[...]                                                     # [R, 1]
    cum = cum_local + pre_rows + carry               # cumsum(fg) at each position

    # global 1-based position of each element within its class
    sub = jax.lax.broadcasted_iota(jnp.int32, (R, L), 0) & (sb - 1)
    lane = jax.lax.broadcasted_iota(jnp.int32, (R, L), 1)
    pos = (i * (sb * L) + sub * L + lane + 1).astype(jnp.float32)              # [R, L]

    # lovasz_grad: jaccard and its adjacent difference (previous value recomputed
    # analytically from (cum - fg, pos - 1), so no cross-block shift is needed)
    inter = gts - cum
    union = gts + (pos - cum)                        # >= 1 everywhere
    jac = 1.0 - inter / union

    cum_prev = cum - fg
    first = pos <= 1.0
    union_prev = jnp.where(first, 1.0, gts + ((pos - 1.0) - cum_prev))
    jac_prev = jnp.where(first, 0.0, 1.0 - (gts - cum_prev) / union_prev)

    grad = jac - jac_prev
    acc_ref[...] += jnp.sum(err * grad, axis=1, keepdims=True)                 # [R, 1]
    carry_ref[...] = carry + blk_class_sum

    @pl.when(i == n - 1)
    def _finalize():
        acc = acc_ref[...]                                                     # [R, 1]
        if present_only:
            present = (gts > 0.0).astype(jnp.float32)                          # [R, 1]
            num = jnp.sum(acc * present, axis=0, keepdims=True)                # [1, 1]
            cnt = jnp.sum(present, axis=0, keepdims=True) * (1.0 / sb)
            loss = jnp.where(cnt > 0.0, num / jnp.maximum(cnt, 1.0), 0.0)
        else:  # classes == 'all'
            loss = jnp.sum(acc, axis=0, keepdims=True) * (1.0 / C)
        out_ref[...] = loss


def lovasz_loss(y_pred, y_true, classes: str = "present"):
    """Lovasz-Softmax loss (per_image=False, ignore=None).

    y_pred: [B, C, H, W] probabilities (NCHW, like PyTorch). y_true: [B, H, W] int labels.
    """
    if y_pred.ndim == 3:
        y_pred = y_pred[:, None]
    B, C, H, W = y_pred.shape

    # flatten_probas equivalent, produced directly in [C, P] layout (no [P, C] detour).
    probas = jnp.transpose(y_pred, (1, 0, 2, 3)).reshape(C, -1).astype(jnp.float32)  # [C, P]
    labels = y_true.reshape(-1)                                                       # [P]
    P = probas.shape[1]

    fg = labels[None, :] == jnp.arange(C, dtype=labels.dtype)[:, None]                # [C, P] bool
    fg_f32 = fg.astype(jnp.float32)
    errors = jnp.abs(fg_f32 - probas)                                                 # [C, P]
    gts = jnp.sum(fg_f32, axis=1)                                                     # [C]

    # One sort per class (descending error), carrying fg along as a bf16 payload.
    # TODO(synk): the sort itself stays in XLA; Pallas TPU has no sort primitive.
    neg_err_sorted, fg_sorted = jax.lax.sort(
        (-errors, fg.astype(jnp.bfloat16)), dimension=1, is_stable=True, num_keys=1)
    err_sorted = -neg_err_sorted                                                      # [C, P]

    # Pad P to whole [SB, LANE] blocks; err=0 / fg=0 tail padding is loss-neutral.
    blk = SB * LANE
    n_blocks = max(1, (P + blk - 1) // blk)
    P_pad = n_blocks * blk
    pad = P_pad - P
    err_k = jnp.pad(err_sorted, ((0, 0), (0, pad))).reshape(C, P_pad // LANE, LANE)
    fg_k = jnp.pad(fg_sorted, ((0, 0), (0, pad))).reshape(C, P_pad // LANE, LANE)
    gts_rows = jnp.repeat(gts, SB)[:, None].astype(jnp.float32)                       # [C*SB, 1]

    kernel = functools.partial(_lovasz_kernel, present_only=(classes == "present"))
    # TODO(synk): single carry-chained P axis uses one TensorCore on v7x; a two-pass
    # cumsum (per-core partials + carry fixup) would be needed to split it.
    out = pl.pallas_call(
        kernel,
        out_shape=jax.ShapeDtypeStruct((1, 1), jnp.float32),
        grid_spec=pltpu.PrefetchScalarGridSpec(
            num_scalar_prefetch=0,
            grid=(n_blocks,),
            in_specs=[
                pl.BlockSpec((C * SB, 1), lambda i: (0, 0)),
                pl.BlockSpec((C, SB, LANE), lambda i: (0, i, 0)),
                pl.BlockSpec((C, SB, LANE), lambda i: (0, i, 0)),
            ],
            out_specs=pl.BlockSpec((1, 1), lambda i: (0, 0)),
            scratch_shapes=[
                pltpu.VMEM((C * SB, 1), jnp.float32),   # running per-class cumsum carry
                pltpu.VMEM((C * SB, 1), jnp.float32),   # per-row err·grad accumulator
            ],
        ),
        compiler_params=pltpu.CompilerParams(
            dimension_semantics=("arbitrary",),
            vmem_limit_bytes=32 * 1024 * 1024,
        ),
    )(gts_rows, err_k, fg_k)
    return out[0, 0]


def lovasz_ref(y_pred, y_true, classes: str = "present"):
    """Pure-JAX reference mirroring the PyTorch lovasz_softmax_flat math."""
    B, C, H, W = y_pred.shape
    probas = jnp.transpose(y_pred, (0, 2, 3, 1)).reshape(-1, C)
    labels = y_true.reshape(-1)
    losses, present = [], []
    for c in range(C):
        fgc = (labels == c).astype(jnp.float32)
        err = jnp.abs(fgc - probas[:, c])
        order = jnp.argsort(-err)
        e_s, fg_s = err[order], fgc[order]
        gts = fg_s.sum()
        inter = gts - jnp.cumsum(fg_s)
        union = gts + jnp.cumsum(1.0 - fg_s)
        jac = 1.0 - inter / union
        jac = jnp.concatenate([jac[:1], jac[1:] - jac[:-1]])
        losses.append(jnp.dot(e_s, jac))
        present.append(gts > 0)
    losses = jnp.stack(losses)
    present = jnp.stack(present)
    if classes == "present":
        cnt = present.sum()
        return jnp.where(
            cnt > 0,
            jnp.sum(jnp.where(present, losses, 0.0)) / jnp.maximum(cnt, 1).astype(jnp.float32),
            0.0,
        )
    return losses.mean()


if __name__ == "__main__":
    key = jax.random.PRNGKey(0)
    k1, k2 = jax.random.split(key)

    # Small shape from the module spec (B=2, C=4, H=W=16): one grid block, padded tail.
    B, C, H, W = 2, 4, 16, 16
    y_pred = jax.nn.softmax(jax.random.normal(k1, (B, C, H, W), jnp.float32), axis=1)
    y_true = jax.random.randint(k2, (B, H, W), 0, C, dtype=jnp.int32)
    loss = jax.block_until_ready(lovasz_loss(y_pred, y_true, classes="present"))
    ref = lovasz_ref(y_pred, y_true, classes="present")
    assert jnp.allclose(loss, ref, atol=2e-5, rtol=2e-5), (loss, ref)

    # Larger shape: exercises the multi-block grid and the cross-block cumsum carry.
    k3, k4 = jax.random.split(k1)
    B2, C2, H2, W2 = 4, 4, 32, 32
    y_pred2 = jax.nn.softmax(jax.random.normal(k3, (B2, C2, H2, W2), jnp.float32), axis=1)
    y_true2 = jax.random.randint(k4, (B2, H2, W2), 0, C2, dtype=jnp.int32)
    loss2 = jax.block_until_ready(lovasz_loss(y_pred2, y_true2, classes="present"))
    ref2 = lovasz_ref(y_pred2, y_true2, classes="present")
    assert jnp.allclose(loss2, ref2, atol=2e-5, rtol=2e-5), (loss2, ref2)

    print("KERNEL_OK")
</pallas_src>

<mosaic_0001>
module attributes {stable_mosaic.version = 11 : i64} {
  func.func @_lovasz_kernel(%arg0: i32, %arg1: memref<64x1xf32, #tpu.memory_space<vmem>>, %arg2: memref<4x16x128xf32, #tpu.memory_space<vmem>>, %arg3: memref<4x16x128xbf16, #tpu.memory_space<vmem>>, %arg4: memref<1x1xf32, #tpu.memory_space<vmem>>, %arg5: memref<64x1xf32, #tpu.memory_space<vmem>>, %arg6: memref<64x1xf32, #tpu.memory_space<vmem>>) attributes {dimension_semantics = [#tpu.dimension_semantics<arbitrary>], iteration_bounds = array<i64: 1>, scalar_prefetch = 0 : i64, scratch_operands = 2 : i64, tpu.core_type = #tpu.core_type<tc>, window_params = [{pipeline_mode = #tpu.pipeline_mode<synchronous>, transform_indices = @transform_0, window_bounds = array<i64: 64, 1>}, {transform_indices = @transform_1, window_bounds = array<i64: 4, 16, 128>}, {transform_indices = @transform_2, window_bounds = array<i64: 4, 16, 128>}, {pipeline_mode = #tpu.pipeline_mode<synchronous>, transform_indices = @transform_3, window_bounds = array<i64: 1, 1>}]} {
    %c0_i32 = arith.constant 0 : i32
    %0 = arith.cmpi eq, %arg0, %c0_i32 : i32
    %1 = arith.extui %0 : i1 to i32
    %c0_i32_0 = arith.constant 0 : i32
    %2 = arith.cmpi ne, %1, %c0_i32_0 : i32
    scf.if %2 {
      %cst_32 = arith.constant 0.000000e+00 : f32
      %96 = vector.broadcast %cst_32 : f32 to vector<64x1xf32>
      %c0_33 = arith.constant 0 : index
      %c0_34 = arith.constant 0 : index
      %97 = vector.load %arg5[%c0_33, %c0_34] : memref<64x1xf32, #tpu.memory_space<vmem>>, vector<64x1xf32>
      tpu.vector_store %arg5[%c0_33, %c0_34], %96 {strides = array<i32>} : memref<64x1xf32, #tpu.memory_space<vmem>>, vector<64x1xf32>,
      %cst_35 = arith.constant 0.000000e+00 : f32
      %98 = vector.broadcast %cst_35 : f32 to vector<64x1xf32>
      %c0_36 = arith.constant 0 : index
      %c0_37 = arith.constant 0 : index
      %99 = vector.load %arg6[%c0_36, %c0_37] : memref<64x1xf32, #tpu.memory_space<vmem>>, vector<64x1xf32>
      tpu.vector_store %arg6[%c0_36, %c0_37], %98 {strides = array<i32>} : memref<64x1xf32, #tpu.memory_space<vmem>>, vector<64x1xf32>,
    } else {
    }
    %c0 = arith.constant 0 : index
    %c0_1 = arith.constant 0 : index
    %c0_2 = arith.constant 0 : index
    %3 = vector.load %arg2[%c0, %c0_1, %c0_2] : memref<4x16x128xf32, #tpu.memory_space<vmem>>, vector<4x16x128xf32>
    %4 = vector.shape_cast %3 : vector<4x16x128xf32> to vector<64x128xf32>
    %c0_3 = arith.constant 0 : index
    %c0_4 = arith.constant 0 : index
    %c0_5 = arith.constant 0 : index
    %5 = vector.load %arg3[%c0_3, %c0_4, %c0_5] : memref<4x16x128xbf16, #tpu.memory_space<vmem>>, vector<4x16x128xbf16>
    %6 = vector.shape_cast %5 : vector<4x16x128xbf16> to vector<64x128xbf16>
    %7 = arith.extf %6 : vector<64x128xbf16> to vector<64x128xf32>
    %c0_6 = arith.constant 0 : index
    %c0_7 = arith.constant 0 : index
    %8 = vector.load %arg1[%c0_6, %c0_7] : memref<64x1xf32, #tpu.memory_space<vmem>>, vector<64x1xf32>
    %9 = tpu.iota {dimensions = array<i32: 0>} : vector<128x128xi32>
    %10 = tpu.iota {dimensions = array<i32: 1>} : vector<128x128xi32>
    %11 = arith.cmpi sle, %9, %10 : vector<128x128xi32>
    %12 = arith.extui %11 : vector<128x128xi1> to vector<128x128xi32>
    %13 = arith.sitofp %12 : vector<128x128xi32> to vector<128x128xf32>
    %14 = arith.truncf %13 : vector<128x128xf32> to vector<128x128xbf16>
    %15 = tpu.iota {dimensions = array<i32: 0>} : vector<64x64xi32>
    %16 = tpu.iota {dimensions = array<i32: 1>} : vector<64x64xi32>
    %c4_i32 = arith.constant 4 : i32
    %17 = vector.broadcast %c4_i32 : i32 to vector<64x64xi32>
    %18 = arith.shrsi %15, %17 : vector<64x64xi32>
    %c4_i32_8 = arith.constant 4 : i32
    %19 = vector.broadcast %c4_i32_8 : i32 to vector<64x64xi32>
    %20 = arith.shrsi %16, %19 : vector<64x64xi32>
    %21 = arith.cmpi eq, %18, %20 : vector<64x64xi32>
    %c15_i32 = arith.constant 15 : i32
    %22 = vector.broadcast %c15_i32 : i32 to vector<64x64xi32>
    %23 = arith.andi %16, %22 : vector<64x64xi32>
    %c15_i32_9 = arith.constant 15 : i32
    %24 = vector.broadcast %c15_i32_9 : i32 to vector<64x64xi32>
    %25 = arith.andi %15, %24 : vector<64x64xi32>
    %26 = arith.cmpi slt, %23, %25 : vector<64x64xi32>
    %27 = arith.andi %21, %26 : vector<64x64xi1>
    %28 = arith.extui %21 : vector<64x64xi1> to vector<64x64xi32>
    %29 = arith.sitofp %28 : vector<64x64xi32> to vector<64x64xf32>
    %30 = arith.truncf %29 : vector<64x64xf32> to vector<64x64xbf16>
    %31 = arith.extui %27 : vector<64x64xi1> to vector<64x64xi32>
    %32 = arith.sitofp %31 : vector<64x64xi32> to vector<64x64xf32>
    %33 = arith.truncf %32 : vector<64x64xf32> to vector<64x64xbf16>
    %cst = arith.constant dense<0.000000e+00> : vector<64x128xf32>
    %34 = tpu.matmul %6, %14, %cst {dimension_numbers = #tpu.dot_dimension_numbers<[1], [0], [0], [1], [0, 0, 1, 1], [], []>} : vector<64x128xbf16>, vector<128x128xbf16>, vector<64x128xf32> -> vector<64x128xf32>
    %cst_10 = arith.constant dense<0.000000e+00> : vector<64x128xf32>
    %35 = tpu.matmul %33, %6, %cst_10 {dimension_numbers = #tpu.dot_dimension_numbers<[1], [0], [0], [1], [0, 0, 1, 1], [], []>} : vector<64x64xbf16>, vector<64x128xbf16>, vector<64x128xf32> -> vector<64x128xf32>
    %cst_11 = arith.constant dense<0.000000e+00> : vector<64xf32>
    %36 = vector.multi_reduction <add>, %35, %cst_11 [1] : vector<64x128xf32> to vector<64xf32>
    %37 = vector.shape_cast %36 : vector<64xf32> to vector<64x1xf32>
    %cst_12 = arith.constant dense<0.000000e+00> : vector<64x128xf32>
    %38 = tpu.matmul %30, %6, %cst_12 {dimension_numbers = #tpu.dot_dimension_numbers<[1], [0], [0], [1], [0, 0, 1, 1], [], []>} : vector<64x64xbf16>, vector<64x128xbf16>, vector<64x128xf32> -> vector<64x128xf32>
    %cst_13 = arith.constant dense<0.000000e+00> : vector<64xf32>
    %39 = vector.multi_reduction <add>, %38, %cst_13 [1] : vector<64x128xf32> to vector<64xf32>
    %40 = vector.shape_cast %39 : vector<64xf32> to vector<64x1xf32>
    %c0_14 = arith.constant 0 : index
    %c0_15 = arith.constant 0 : index
    %41 = vector.load %arg5[%c0_14, %c0_15] : memref<64x1xf32, #tpu.memory_space<vmem>>, vector<64x1xf32>
    %42 = vector.broadcast %37 : vector<64x1xf32> to vector<64x128xf32>
    %43 = arith.addf %34, %42 : vector<64x128xf32>
    %44 = vector.broadcast %41 : vector<64x1xf32> to vector<64x128xf32>
    %45 = arith.addf %43, %44 : vector<64x128xf32>
    %46 = tpu.iota {dimensions = array<i32: 0>} : vector<64x128xi32>
    %c15_i32_16 = arith.constant 15 : i32
    %47 = vector.broadcast %c15_i32_16 : i32 to vector<64x128xi32>
    %48 = arith.andi %46, %47 : vector<64x128xi32>
    %49 = tpu.iota {dimensions = array<i32: 1>} : vector<64x128xi32>
    %c2048_i32 = arith.constant 2048 : i32
    %50 = arith.muli %arg0, %c2048_i32 : i32
    %c128_i32 = arith.constant 128 : i32
    %51 = vector.broadcast %c128_i32 : i32 to vector<64x128xi32>
    %52 = arith.muli %48, %51 : vector<64x128xi32>
    %53 = vector.broadcast %50 : i32 to vector<64x128xi32>
    %54 = arith.addi %53, %52 : vector<64x128xi32>
    %55 = arith.addi %54, %49 : vector<64x128xi32>
    %c1_i32 = arith.constant 1 : i32
    %56 = vector.broadcast %c1_i32 : i32 to vector<64x128xi32>
    %57 = arith.addi %55, %56 : vector<64x128xi32>
    %58 = arith.sitofp %57 : vector<64x128xi32> to vector<64x128xf32>
    %59 = vector.broadcast %8 : vector<64x1xf32> to vector<64x128xf32>
    %60 = arith.subf %59, %45 : vector<64x128xf32>
    %61 = arith.subf %58, %45 : vector<64x128xf32>
    %62 = vector.broadcast %8 : vector<64x1xf32> to vector<64x128xf32>
    %63 = arith.addf %62, %61 : vector<64x128xf32>
    %64 = arith.divf %60, %63 : vector<64x128xf32>
    %cst_17 = arith.constant 1.000000e+00 : f32
    %65 = vector.broadcast %cst_17 : f32 to vector<64x128xf32>
    %66 = arith.subf %65, %64 : vector<64x128xf32>
    %67 = arith.subf %45, %7 : vector<64x128xf32>
    %cst_18 = arith.constant 1.000000e+00 : f32
    %68 = vector.broadcast %cst_18 : f32 to vector<64x128xf32>
    %69 = arith.cmpf ole, %58, %68 : vector<64x128xf32>
    %cst_19 = arith.constant 1.000000e+00 : f32
    %70 = vector.broadcast %cst_19 : f32 to vector<64x128xf32>
    %71 = arith.subf %58, %70 : vector<64x128xf32>
    %72 = arith.subf %71, %67 : vector<64x128xf32>
    %73 = vector.broadcast %8 : vector<64x1xf32> to vector<64x128xf32>
    %74 = arith.addf %73, %72 : vector<64x128xf32>
    %cst_20 = arith.constant 1.000000e+00 : f32
    %75 = vector.broadcast %cst_20 : f32 to vector<64x128xf32>
    %76 = arith.select %69, %75, %74 : vector<64x128xi1>, vector<64x128xf32>
    %77 = vector.broadcast %8 : vector<64x1xf32> to vector<64x128xf32>
    %78 = arith.subf %77, %67 : vector<64x128xf32>
    %79 = arith.divf %78, %76 : vector<64x128xf32>
    %cst_21 = arith.constant 1.000000e+00 : f32
    %80 = vector.broadcast %cst_21 : f32 to vector<64x128xf32>
    %81 = arith.subf %80, %79 : vector<64x128xf32>
    %cst_22 = arith.constant 0.000000e+00 : f32
    %82 = vector.broadcast %cst_22 : f32 to vector<64x128xf32>
    %83 = arith.select %69, %82, %81 : vector<64x128xi1>, vector<64x128xf32>
    %84 = arith.subf %66, %83 : vector<64x128xf32>
    %c0_23 = arith.constant 0 : index
    %c0_24 = arith.constant 0 : index
    %85 = vector.load %arg6[%c0_23, %c0_24] : memref<64x1xf32, #tpu.memory_space<vmem>>, vector<64x1xf32>
    %86 = arith.mulf %4, %84 : vector<64x128xf32>
    %cst_25 = arith.constant dense<0.000000e+00> : vector<64xf32>
    %87 = vector.multi_reduction <add>, %86, %cst_25 [1] : vector<64x128xf32> to vector<64xf32>
    %88 = vector.shape_cast %87 : vector<64xf32> to vector<64x1xf32>
    %89 = arith.addf %85, %88 : vector<64x1xf32>
    %c0_26 = arith.constant 0 : index
    %c0_27 = arith.constant 0 : index
    %90 = vector.load %arg6[%c0_26, %c0_27] : memref<64x1xf32, #tpu.memory_space<vmem>>, vector<64x1xf32>
    tpu.vector_store %arg6[%c0_26, %c0_27], %89 {strides = array<i32>} : memref<64x1xf32, #tpu.memory_space<vmem>>, vector<64x1xf32>,
    %91 = arith.addf %41, %40 : vector<64x1xf32>
    %c0_28 = arith.constant 0 : index
    %c0_29 = arith.constant 0 : index
    %92 = vector.load %arg5[%c0_28, %c0_29] : memref<64x1xf32, #tpu.memory_space<vmem>>, vector<64x1xf32>
    tpu.vector_store %arg5[%c0_28, %c0_29], %91 {strides = array<i32>} : memref<64x1xf32, #tpu.memory_space<vmem>>, vector<64x1xf32>,
    %c0_i32_30 = arith.constant 0 : i32
    %93 = arith.cmpi eq, %arg0, %c0_i32_30 : i32
    %94 = arith.extui %93 : i1 to i32
    %c0_i32_31 = arith.constant 0 : i32
    %95 = arith.cmpi ne, %94, %c0_i32_31 : i32
    scf.if %95 {
      %c0_32 = arith.constant 0 : index
      %c0_33 = arith.constant 0 : index
      %96 = vector.load %arg6[%c0_32, %c0_33] : memref<64x1xf32, #tpu.memory_space<vmem>>, vector<64x1xf32>
      %cst_34 = arith.constant 0.000000e+00 : f32
      %97 = vector.broadcast %cst_34 : f32 to vector<64x1xf32>
      %98 = arith.cmpf ogt, %8, %97 : vector<64x1xf32>
      %99 = arith.extui %98 : vector<64x1xi1> to vector<64x1xi32>
      %100 = arith.sitofp %99 : vector<64x1xi32> to vector<64x1xf32>
      %101 = arith.mulf %96, %100 : vector<64x1xf32>
      %cst_35 = arith.constant dense<0.000000e+00> : vector<1xf32>
      %102 = vector.multi_reduction <add>, %101, %cst_35 [0] : vector<64x1xf32> to vector<1xf32>
      %103 = vector.shape_cast %102 : vector<1xf32> to vector<1x1xf32>
      %cst_36 = arith.constant dense<0.000000e+00> : vector<1xf32>
      %104 = vector.multi_reduction <add>, %100, %cst_36 [0] : vector<64x1xf32> to vector<1xf32>
      %105 = vector.shape_cast %104 : vector<1xf32> to vector<1x1xf32>
      %cst_37 = arith.constant 6.250000e-02 : f32
      %106 = vector.broadcast %cst_37 : f32 to vector<1x1xf32>
      %107 = arith.mulf %105, %106 : vector<1x1xf32>
      %cst_38 = arith.constant 0.000000e+00 : f32
      %108 = vector.broadcast %cst_38 : f32 to vector<1x1xf32>
      %109 = arith.cmpf ogt, %107, %108 : vector<1x1xf32>
      %cst_39 = arith.constant 1.000000e+00 : f32
      %110 = vector.broadcast %cst_39 : f32 to vector<1x1xf32>
      %111 = arith.maximumf %107, %110 : vector<1x1xf32>
      %112 = arith.divf %103, %111 : vector<1x1xf32>
      %cst_40 = arith.constant 0.000000e+00 : f32
      %113 = vector.broadcast %cst_40 : f32 to vector<1x1xf32>
      %114 = arith.select %109, %112, %113 : vector<1x1xi1>, vector<1x1xf32>
      %c0_41 = arith.constant 0 : index
      %c0_42 = arith.constant 0 : index
      %115 = vector.load %arg4[%c0_41, %c0_42] : memref<1x1xf32, #tpu.memory_space<vmem>>, vector<1x1xf32>
      tpu.vector_store %arg4[%c0_41, %c0_42], %114 {strides = array<i32>} : memref<1x1xf32, #tpu.memory_space<vmem>>, vector<1x1xf32>,
    } else {
    }
    return
  }
  func.func @transform_0(%arg0: i32) -> (i32, i32) {
    %c0_i32 = arith.constant 0 : i32
    %c0_i32_0 = arith.constant 0 : i32
    %c0_i32_1 = arith.constant 0 : i32
    return %c0_i32, %c0_i32_0 : i32, i32
  }
  func.func @transform_1(%arg0: i32) -> (i32, i32, i32) {
    %c0_i32 = arith.constant 0 : i32
    %c0_i32_0 = arith.constant 0 : i32
    %c0_i32_1 = arith.constant 0 : i32
    return %c0_i32, %arg0, %c0_i32_0 : i32, i32, i32
  }
  func.func @transform_2(%arg0: i32) -> (i32, i32, i32) {
    %c0_i32 = arith.constant 0 : i32
    %c0_i32_0 = arith.constant 0 : i32
    %c0_i32_1 = arith.constant 0 : i32
    return %c0_i32, %arg0, %c0_i32_0 : i32, i32, i32
  }
  func.func @transform_3(%arg0: i32) -> (i32, i32) {
    %c0_i32 = arith.constant 0 : i32
    %c0_i32_0 = arith.constant 0 : i32
    %c0_i32_1 = arith.constant 0 : i32
    return %c0_i32, %c0_i32_0 : i32, i32
  }
}

</mosaic_0001>

<bundles_post_ra>
// kernel: tpu_custom_call.1
= control target key start
LH: loop header
LB: loop body
LE: loop exit
PB: predicated region body
PF: predicated region fallthrough
CT: control target
= control target key end

     0   :  { %8 = vsyncpa [#allocation5], 0  ;;  %s2304_s0 = inlined_call_operand.vmem [shape: f32[64,1], index: 0, kind: input, shape index: {}]   ;;  %s2305_s1 = inlined_call_operand.vmem [shape: f32[4,16,128], index: 1, kind: input, shape index: {}]   ;;  %s2306_s2 = inlined_call_operand.hbm [shape: bf16[4,16,128], index: 2, kind: input, shape index: {}]   ;;  %s2307_s3 = inlined_call_operand.hbm [shape: f32[1,1], index: 3, kind: output, shape index: {}]  }
   0x1   :  { %9 = vsyncpa [#allocation6], 0  ;;  %s18_s14 = sshll.u32 %s2306_s2, 4  ;;  %s1290_s15 = smov [#allocation4]   ;;  %s19_s14 = int_to_ptr.hbm [resolvable:$true] %s18_s14 }
   0x2   :  { %s20_s16 = sshll.u32 %s1290_s15, 4  ;;  %s1291_s17 = smov 64   ;;  %s21_s16 = int_to_ptr.vmem [resolvable:$true] %s20_s16 }
   0x3   :  { %s1292_s18 = smov 4  }
   0x4   :  { %26 = dma.hbm_to_vmem [thread:$0]  %s19_s14, 512, %s21_s16, [#allocation5], %s1291_s17, %s1291_s17, %s1292_s18  }
   0x5   :  { %1286 = dma.done.wait [#allocation5], 512  }
   0x6   :  { %1287 = vsyncadd [#allocation5], 4294966784  ;;  %v85_v0 = vlaneseq  ;;  %v1335_v8 = vld [vmem:[#allocation4 + $0x18] sm:$0xff]  ;;  %v1340_v11 = vld [vmem:[#allocation4 + $0x10] sm:$0xff]  ;;  %v1293_v14 = vmov 0.0   ;;  %vm2308_vm6 = vcmask 523264  }
   0x7   :  { %283 = vmatpush.bf16.msra.mxu0 %v1335_v8  ;;  %340 = vmatpush.bf16.msra.mxu1 %v1335_v8  ;;  %v1352_v12 = vld [vmem:[#allocation4 + $0x8] sm:$0xff]  ;;  %v1356_v13 = vld [vmem:[#allocation4] sm:$0xff]  ;;  %vm2309_vm15 = vcmask 7168   ;;  %v1294_v42 = vmov 0   ;;  %v1463_v48 = vld [vmem:[%s2304_s0 + $0x10] sm:$0xff]  ;;  %s1078_s24 = sshll.u32 %s2307_s3, 4  ;;  %s1079_s24 = int_to_ptr.hbm [resolvable:$true] %s1078_s24 }
   0x8   :  { %v1320_v1 = vshrl.u32 %v85_v0, 7  ;;  %v1322_v2 = vand.u32 127, %v85_v0  ;;  %1195 = vset.pattern.permute.xlu1 %v1294_v42  ;;  %37 = vst.msk [vmem:[#allocation2] sm:$0xff] %vm2309_vm15, %v1293_v14  ;;  %1197 = vset.pattern.permute.xlu0 %v1294_v42  ;;  %v1439_v43 = vld [vmem:[%s2304_s0 + $0x8] sm:$0xff]  ;;  %v1295_v50 = vmov 1.0|1.0  }
   0x9   :  { %38 = vst.msk [vmem:[#allocation2 + $0x8] sm:$0xff] %vm2309_vm15, %v1293_v14  ;;  %1196 = vset.pattern.permute.xlu2 %v1294_v42  ;;  %v1481_v53 = vld [vmem:[%s2304_s0] sm:$0xff] }
   0xa   :  { %v1325_v3 = vadd.s32 8, %v1320_v1  ;;  %v160_v4 = vshra.s32 %v1320_v1, 4  ;;  %v1329_v5 = vshra.s32 %v1322_v2, 4  ;;  %v1332_v6 = vand.u32 15, %v1322_v2  ;;  %39 = vst.msk [vmem:[#allocation2 + $0x10] sm:$0xff] %vm2309_vm15, %v1293_v14 }
   0xb   :  { %v178_v7 = vand.u32 15, %v1320_v1  ;;  %284 = vmatpush.bf16.msra.mxu0 %v1340_v11  ;;  %341 = vmatpush.bf16.msra.mxu1 %v1340_v11  ;;  %v1364_v19 = vadd.s32 16, %v1320_v1  ;;  %v1367_v20 = vadd.s32 24, %v1320_v1  ;;  %v1398_v29 = vadd.s32 32, %v1320_v1  ;;  %40 = vst.msk [vmem:[#allocation2 + $0x18] sm:$0xff] %vm2309_vm15, %v1293_v14 }
   0xc   :  { %v161_v9 = vshra.s32 %v1325_v3, 4  ;;  %v179_v10 = vand.u32 15, %v1325_v3  ;;  %vm169_vm0 = vcmp.eq.s32.totalorder %v160_v4, %v1329_v5  ;;  %v1403_v32 = vadd.s32 40, %v1320_v1  ;;  %41 = vst.msk [vmem:[#allocation2 + $0x20] sm:$0xff] %vm2309_vm15, %v1293_v14 }
   0xd   :  { %vm186_vm1 = vcmp.lt.s32.totalorder %v1332_v6, %v178_v7  ;;  %v1104_v17 = vsel %vm169_vm0, 1.0, %v1293_v14  ;;  %v162_v23 = vshra.s32 %v1364_v19, 4  ;;  %v180_v24 = vand.u32 15, %v1364_v19  ;;  %42 = vst.msk [vmem:[#allocation2 + $0x28] sm:$0xff] %vm2309_vm15, %v1293_v14 }
   0xe   :  { %vm170_vm2 = vcmp.eq.s32.totalorder %v161_v9, %v1329_v5  ;;  %vm187_vm3 = vcmp.lt.s32.totalorder %v1332_v6, %v179_v10  ;;  %vm194_vm4 = vmand %vm169_vm0, %vm186_vm1  ;;  %v163_v25 = vshra.s32 %v1367_v20, 4  ;;  %v181_v26 = vand.u32 15, %v1367_v20  ;;  %43 = vst.msk [vmem:[#allocation2 + $0x30] sm:$0xff] %vm2309_vm15, %v1293_v14 }
   0xf   :  { %vm195_vm5 = vmand %vm170_vm2, %vm187_vm3  ;;  %285 = vmatpush.bf16.msra.mxu0 %v1352_v12  ;;  %v1112_v15 = vsel %vm194_vm4, 1.0, %v1293_v14  ;;  %342 = vmatpush.bf16.msra.mxu1 %v1352_v12  ;;  %v1105_v18 = vsel %vm170_vm2, 1.0, %v1293_v14  ;;  %vm1378_vm7 = vcmp.eq.s32.totalorder %v162_v23, %v1329_v5  ;;  %vm188_vm8 = vcmp.lt.s32.totalorder %v1332_v6, %v180_v24  ;;  %v1510_v60 = vld [vmem:[#allocation2] sm:$0xff]  ;;  %44 = vst.msk [vmem:[#allocation2 + $0x38] sm:$0xff] %vm2309_vm15, %v1293_v14 }
  0x10   :  { %v1113_v16 = vsel %vm195_vm5, 1.0, %v1293_v14  ;;  %v218_v22 = vpack.c.bf16 %v1105_v18, %v1104_v17  ;;  %vm1386_vm9 = vcmp.eq.s32.totalorder %v163_v25, %v1329_v5  ;;  %vm189_vm10 = vcmp.lt.s32.totalorder %v1332_v6, %v181_v26  ;;  %vm196_vm11 = vmand %vm1378_vm7, %vm188_vm8  ;;  %420 = vperm.xlu1 %1195, %v1510_v60   ;;  %45 = vst.msk [vmem:[#allocation3] sm:$0xff] %vm2309_vm15, %v1293_v14  ;;  %v1533_v4 = vld [vmem:[#allocation2 + $0x8] sm:$0xff]  ;;  %v84_v18 = vld [vmem:[%s2304_s0 + $0x38] sm:$0xff] }
  0x11   :  { %v238_v21 = vpack.c.bf16 %v1113_v16, %v1112_v15  ;;  %vm197_vm12 = vmand %vm1386_vm9, %vm189_vm10  ;;  %v1114_v30 = vsel %vm196_vm11, 1.0, %v1293_v14  ;;  %v164_v34 = vshra.s32 %v1398_v29, 4  ;;  %v182_v35 = vand.u32 15, %v1398_v29  ;;  %46 = vst.msk [vmem:[#allocation3 + $0x8] sm:$0xff] %vm2309_vm15, %v1293_v14  ;;  %v383_v17 = vld [vmem:[#allocation2 + $0x10] sm:$0xff]  ;;  %425 = vperm.xlu2 %1196, %v1533_v4  }
  0x12   :  { %v1115_v31 = vsel %vm197_vm12, 1.0, %v1293_v14  ;;  %v165_v36 = vshra.s32 %v1403_v32, 4  ;;  %v183_v37 = vand.u32 15, %v1403_v32  ;;  %v100_v44 = vadd.s32 112, %v1320_v1  ;;  %47 = vst.msk [vmem:[#allocation3 + $0x10] sm:$0xff] %vm2309_vm15, %v1293_v14  ;;  %430 = vperm.xlu0 %1197, %v383_v17  }
  0x13   :  { %286 = vmatpush.bf16.msra.mxu0 %v1356_v13  ;;  %343 = vmatpush.bf16.msra.mxu1 %v1356_v13  ;;  %v239_v33 = vpack.c.bf16 %v1115_v31, %v1114_v30  ;;  %vm1411_vm13 = vcmp.eq.s32.totalorder %v164_v34, %v1329_v5  ;;  %vm1418_vm14 = vcmp.lt.s32.totalorder %v1332_v6, %v182_v35  ;;  %v101_v45 = vadd.s32 120, %v1320_v1  ;;  %v385_v39 = vld [vmem:[#allocation2 + $0x20] sm:$0xff] }
  0x14   :  { %vm1423_vm0 = vcmp.eq.s32.totalorder %v165_v36, %v1329_v5  ;;  %vm1430_vm1 = vcmp.lt.s32.totalorder %v1332_v6, %v183_v37  ;;  %vm977_vm2 = vcmp.gt.f32.partialorder %v1439_v43, 0.0  ;;  %v98_v46 = vadd.s32 96, %v1320_v1  ;;  %vm198_vm3 = vmand %vm1411_vm13, %vm1418_vm14  ;;  %48 = vst.msk [vmem:[#allocation3 + $0x18] sm:$0xff] %vm2309_vm15, %v1293_v14 }
  0x15   :  { %v99_v47 = vadd.s32 104, %v1320_v1  ;;  %vm118_vm4 = vcmp.le.s32.totalorder %v100_v44, %v1322_v2  ;;  %vm119_vm5 = vcmp.le.s32.totalorder %v101_v45, %v1322_v2  ;;  %vm199_vm12 = vmand %vm1423_vm0, %vm1430_vm1  ;;  %v1472_v49 = vsel %vm977_vm2, 1.0, %v1293_v14  ;;  %49 = vst.msk [vmem:[#allocation3 + $0x20] sm:$0xff] %vm2309_vm15, %v1293_v14  ;;  %v384_v44 = vld [vmem:[#allocation2 + $0x18] sm:$0xff]  ;;  %v387_v45 = vld [vmem:[#allocation2 + $0x30] sm:$0xff] }
  0x16   :  { %1136 = vmatmul.msk.bf16.vlgmr.msra.gmra.mxu0 %vm2308_vm6, %v238_v21  ;;  %1140 = vmatmul.msk.bf16.vlgmr.msra.gmra.mxu1 %vm2308_vm6, %v218_v22  ;;  %vm1144_vm8 = vmpackc.low %vm119_vm5, %vm118_vm4  ;;  %vm116_vm10 = vcmp.le.s32.totalorder %v98_v46, %v1322_v2  ;;  %vm978_vm4 = vcmp.gt.f32.partialorder %v1463_v48, 0.0  ;;  %v96_v51 = vadd.s32 80, %v1320_v1  ;;  %v97_v52 = vadd.s32 88, %v1320_v1  ;;  %v1560_v21 = vld [vmem:[%s2304_s0 + $0x18] sm:$0xff]  ;;  %50 = vst.msk [vmem:[#allocation3 + $0x28] sm:$0xff] %vm2309_vm15, %v1293_v14 }
  0x17   :  { %vm117_vm11 = vcmp.le.s32.totalorder %v99_v47, %v1322_v2  ;;  %1145 = vmatpush.bf16.msk.msra.mxu2 %vm1144_vm8, %v1295_v50  ;;  %1180 = vmatpush.bf16.msk.msra.mxu3 %vm1144_vm8, %v1295_v50  ;;  %v1030_v54 = vsel %vm2309_vm15, %v1472_v49, 0.0  ;;  %v94_v56 = vadd.s32 64, %v1320_v1  ;;  %vm976_vm5 = vcmp.gt.f32.partialorder %v1481_v53, 0.0  ;;  %51 = vst.msk [vmem:[#allocation3 + $0x30] sm:$0xff] %vm2309_vm15, %v1293_v14 }
  0x18   :  { %vm1490_vm2 = vmpackc.low %vm117_vm11, %vm116_vm10  ;;  %vm114_vm8 = vcmp.le.s32.totalorder %v96_v51, %v1322_v2  ;;  %v95_v57 = vadd.s32 72, %v1320_v1  ;;  %v1502_v58 = vsel %vm976_vm5, 1.0, %v1293_v14  ;;  %v1116_v59 = vsel %vm198_vm3, 1.0, %v1293_v14  ;;  %52 = vst.msk [vmem:[#allocation3 + $0x38] sm:$0xff] %vm2309_vm15, %v1293_v14  ;;  %440 = vperm.xlu1 %1195, %v385_v39  }
  0x19   :  { %v1517_v61 = vsel %vm978_vm4, 1.0, %v1293_v14  ;;  %v1029_v62 = vsel %vm2309_vm15, %v1502_v58, 0.0  ;;  %v1117_v63 = vsel %vm199_vm12, 1.0, %v1293_v14  ;;  %v1528_v0 = vadd.s32 48, %v1320_v1  ;;  %435 = vperm.xlu2 %1196, %v384_v44  }
  0x1a   :  { %v1032_v9 = vsel %vm2309_vm15, %v1517_v61, 0.0  ;;  %v1031_v15 = vadd.f32 %v1030_v54, %v1029_v62  ;;  %v1541_v16 = vadd.s32 56, %v1320_v1  ;;  %vm112_vm1 = vcmp.le.s32.totalorder %v94_v56, %v1322_v2  ;;  %450 = vperm.xlu0 %1197, %v387_v45  }
  0x1b   :  { %1147 = vmatpush.bf16.msk.msra.mxu2 %vm1490_vm2, %v1295_v50  ;;  %1181 = vmatpush.bf16.msk.msra.mxu3 %vm1490_vm2, %v1295_v50  ;;  %vm979_vm3 = vcmp.gt.f32.partialorder %v1560_v21, 0.0  ;;  %v240_v22 = vpack.c.bf16 %v1117_v63, %v1116_v59  ;;  %v166_v30 = vshra.s32 %v1528_v0, 4  ;;  %v184_v31 = vand.u32 15, %v1528_v0 }
  0x1c   :  { %v1570_v23 = vsel %vm979_vm3, 1.0, %v1293_v14  ;;  %v1033_v25 = vadd.f32 %v1032_v9, %v1031_v15  ;;  %v167_v34 = vshra.s32 %v1541_v16, 4  ;;  %v185_v36 = vand.u32 15, %v1541_v16 }
  0x1d   :  { %vm110_vm11 = vcmp.le.s32.totalorder %v1528_v0, %v1322_v2  ;;  %vm111_vm12 = vcmp.le.s32.totalorder %v1541_v16, %v1322_v2  ;;  %vm2328_vm4 = vcmask 523264   ;;  %vm1608_vm2 = vcmp.eq.s32.totalorder %v166_v30, %v1329_v5 }
  0x1e   :  { %vm1615_vm5 = vcmp.lt.s32.totalorder %v1332_v6, %v184_v31  ;;  %vm109_vm3 = vcmp.le.s32.totalorder %v1403_v32, %v1322_v2  ;;  %v1106_v44 = vsel %vm1378_vm7, 1.0, %v1293_v14  ;;  %v1107_v45 = vsel %vm1386_vm9, 1.0, %v1293_v14 }
  0x1f   :  { %v219_v47 = vpack.c.bf16 %v1107_v45, %v1106_v44 }
  0x20   :  { %515 = vperm.xlu1 %1195, %v1439_v43   ;;  %v386_v43 = vld [vmem:[#allocation2 + $0x28] sm:$0xff] }
  0x21   :  { %510 = vperm.xlu2 %1196, %v1481_v53   ;;  %v388_v53 = vld [vmem:[#allocation2 + $0x38] sm:$0xff] }
  0x26   :  { %1137 = vmatmul.msk.bf16.gmra.mxu0 %vm2308_vm6, %v239_v33  ;;  %vm115_vm6 = vcmp.le.s32.totalorder %v97_v52, %v1322_v2  ;;  %v1034_v33 = vsel %vm2309_vm15, %v1570_v23, 0.0  ;;  %vm107_vm15 = vcmp.le.s32.totalorder %v1367_v20, %v1322_v2 }
  0x27   :  { %vm1550_vm14 = vmpackc.low %vm115_vm6, %vm114_vm8  ;;  %vm113_vm6 = vcmp.le.s32.totalorder %v95_v57, %v1322_v2  ;;  %v1596_v42 = vadd.f32 %v1034_v33, %v1033_v25  ;;  %vm1623_vm8 = vcmp.eq.s32.totalorder %v167_v34, %v1329_v5  ;;  %v81_v5 = vld [vmem:[%s2304_s0 + $0x20] sm:$0xff] }
  0x28   :  { %1149 = vmatpush.bf16.msk.msra.mxu2 %vm1550_vm14, %v1295_v50  ;;  %vm1589_vm10 = vmpackc.low %vm113_vm6, %vm112_vm1  ;;  %1182 = vmatpush.bf16.msk.msra.mxu3 %vm1550_vm14, %v1295_v50  ;;  %vm1630_vm14 = vcmp.lt.s32.totalorder %v1332_v6, %v185_v36  ;;  %vm108_vm6 = vcmp.le.s32.totalorder %v1398_v29, %v1322_v2 }
  0x29   :  { %vm1152_vm1 = vmpackc.low %vm111_vm12, %vm110_vm11  ;;  %vm106_vm12 = vcmp.le.s32.totalorder %v1364_v19, %v1322_v2  ;;  %530 = vperm.xlu0 %1197, %v81_v5   ;;  %520 = vperm.xlu1 %1195, %v1463_v48  }
  0x2a   :  { %vm201_vm11 = vmand %vm1623_vm8, %vm1630_vm14  ;;  %vm104_vm14 = vcmp.le.s32.totalorder %v1320_v1, %v1322_v2  ;;  %445 = vperm.xlu2 %1196, %v386_v43  }
  0x2b   :  { %v1119_v54 = vsel %vm201_vm11, 1.0, %v1293_v14 }
  0x2c   :  { %1151 = vmatpush.bf16.msk.msra.mxu2 %vm1589_vm10, %v1295_v50  ;;  %1183 = vmatpush.bf16.msk.msra.mxu3 %vm1589_vm10, %v1295_v50  ;;  %vm1154_vm10 = vmpackc.low %vm109_vm3, %vm108_vm6  ;;  %vm2337_vm3 = vcmask 523264  }
  0x2d   :  { %vm2343_vm7 = vmmov %vm2337_vm3 }
  0x2e   :  { %vm2344_vm9 = vmmov %vm2337_vm3 }
  0x30   :  { %1153 = vmatpush.bf16.msk.msra.mxu2 %vm1152_vm1, %v1295_v50  ;;  %1184 = vmatpush.bf16.msk.msra.mxu3 %vm1152_vm1, %v1295_v50  ;;  %vm105_vm1 = vcmp.le.s32.totalorder %v1325_v3, %v1322_v2 }
  0x31   :  { %vm1158_vm6 = vmpackc.low %vm105_vm1, %vm104_vm14  ;;  %455 = vperm.xlu1 %1195, %v388_v53  }
  0x32   :  { %525 = vperm.xlu2 %1196, %v1560_v21  }
  0x34   :  { %1155 = vmatpush.bf16.msk.msra.mxu2 %vm1154_vm10, %v1295_v50  ;;  %1185 = vmatpush.bf16.msk.msra.mxu3 %vm1154_vm10, %v1295_v50 }
  0x36   :  { %1138 = vmatmul.msk.bf16.gmra.mxu0 %vm2328_vm4, %v240_v22  ;;  %vm200_vm4 = vmand %vm1608_vm2, %vm1615_vm5  ;;  %v83_v22 = vld [vmem:[%s2304_s0 + $0x30] sm:$0xff] }
  0x37   :  { %v1118_v6 = vsel %vm200_vm4, 1.0, %v1293_v14  ;;  %vm1156_vm5 = vmpackc.low %vm107_vm15, %vm106_vm12  ;;  %vm980_vm15 = vcmp.gt.f32.partialorder %v81_v5, 0.0  ;;  %vm2338_vm4 = vcmask 7168   ;;  %vm983_vm12 = vcmp.gt.f32.partialorder %v84_v18, 0.0 }
  0x38   :  { %v241_v55 = vpack.c.bf16 %v1119_v54, %v1118_v6  ;;  %1157 = vmatpush.bf16.msk.msra.mxu2 %vm1156_vm5, %v1295_v50  ;;  %1186 = vmatpush.bf16.msk.msra.mxu3 %vm1156_vm5, %v1295_v50  ;;  %vm2339_vm10 = vmmov %vm2338_vm4  ;;  %v1697_v21 = vsel %vm983_vm12, 1.0, %v1293_v14  ;;  %vm982_vm5 = vcmp.gt.f32.partialorder %v83_v22, 0.0  ;;  %v1108_v5 = vsel %vm1411_vm13, 1.0, %v1293_v14 }
  0x39   :  { %v1703_v25 = vsel %vm982_vm5, 1.0, %v1293_v14  ;;  %vm2340_vm14 = vmmov %vm2338_vm4  ;;  %v1109_v6 = vsel %vm1423_vm0, 1.0, %v1293_v14  ;;  %v1110_v54 = vsel %vm1608_vm2, 1.0, %v1293_v14 }
  0x3a   :  { %v1042_v33 = vsel %vm2340_vm14, %v1697_v21, 0.0  ;;  %vm2341_vm1 = vmmov %vm2338_vm4  ;;  %v220_v27 = vpack.c.bf16 %v1109_v6, %v1108_v5 }
  0x3b   :  { %v1040_v34 = vsel %vm2341_vm1, %v1703_v25, 0.0  ;;  %vm2345_vm13 = vmmov %vm2341_vm1 }
  0x3c   :  { %1159 = vmatpush.bf16.msk.msra.mxu2 %vm1158_vm6, %v1295_v50  ;;  %1187 = vmatpush.bf16.msk.msra.mxu3 %vm1158_vm6, %v1295_v50  ;;  %vm2342_vm6 = vmmov %vm2337_vm3 }
  0x3d   :  { %1141 = vmatmul.msk.bf16.gmra.mxu1 %vm2342_vm6, %v219_v47 }
  0x3f   :  { %397 = vmatmul.bf16.vlgmr.msra.gmra.mxu2 %v1356_v13  ;;  %402 = vmatmul.bf16.vlgmr.msra.gmra.mxu3 %v1352_v12  ;;  %v1680_v12 = vsel %vm980_vm15, 1.0, %v1293_v14 }
  0x40   :  { %v1036_v13 = vsel %vm2338_vm4, %v1680_v12, 0.0 }
  0x41   :  { %v1037_v62 = vadd.f32 %v1036_v13, %v1596_v42 }
  0x46   :  { %1139 = vmatmul.msk.bf16.gmra.mxu0 %vm2337_vm3, %v241_v55  ;;  %v1111_v55 = vsel %vm1623_vm8, 1.0, %v1293_v14  ;;  %vm2346_vm8 = vmmov %vm2341_vm1 }
  0x47   :  { %v221_v43 = vpack.c.bf16 %v1111_v55, %v1110_v54 }
  0x4d   :  { %1142 = vmatmul.msk.bf16.gmra.mxu1 %vm2343_vm7, %v220_v27 }
  0x4f   :  { %407 = vmatmul.bf16.gmra.mxu3 %v1340_v11 }
  0x5d   :  { %1143 = vmatmul.msk.bf16.gmra.mxu1 %vm2344_vm9, %v221_v43 }
  0x5f   :  { %412 = vmatmul.bf16.gmra.mxu3 %v1335_v8  ;;  %v82_v8 = vld [vmem:[%s2304_s0 + $0x28] sm:$0xff] }
  0x60   :  { %vm981_vm11 = vcmp.gt.f32.partialorder %v82_v8, 0.0 }
  0x61   :  { %v1689_v63 = vsel %vm981_vm11, 1.0, %v1293_v14  ;;  %v467_v14 = vmul.u32 128, %v178_v7  ;;  %v469_v7 = vmul.u32 128, %v180_v24 }
  0x62   :  { %v1038_v9 = vsel %vm2339_vm10, %v1689_v63, 0.0 }
  0x63   :  { %v1039_v15 = vadd.f32 %v1038_v9, %v1037_v62  ;;  %v486_v20 = vadd.s32 %v469_v7, %v1322_v2 }
  0x65   :  { %v1041_v39 = vadd.f32 %v1040_v34, %v1039_v15  ;;  %v61_v15 = vld [vmem:[#allocation4] sm:$0xff]   ;;  %v471_v34 = vmul.u32 128, %v182_v35  ;;  %v494_v27 = vadd.s32 1, %v486_v20 }
  0x66   :  { %v70_v55 = vunpack.c.h.bf16 %v61_v15 }
  0x67   :  { %v1709_v41 = vadd.f32 %v1042_v33, %v1041_v39  ;;  %v69_v33 = vunpack.c.l.bf16 %v61_v15 }
  0x6b   :  { %v426_v28 = vpop.permute.xlu2 %425 }
  0x73   :  { %v1731_v38 = vpop.permute.xlu2 %435 }
  0x7b   :  { %v1734_v53 = vpop.permute.xlu2 %510 }
  0x82   :  { %v421_v40 = vpop.permute.xlu1 %420 }
  0x93   :  { %v288_v56 = vpop.f32.mrf.mxu0  ;;  %v345_v57 = vpop.f32.mrf.mxu1 }
  0x94   :  { %308 = vadd.xlane.f32.xlu0 %v288_v56  ;;  %365 = vadd.xlane.f32.xlu2 %v345_v57  ;;  %v1736_v56 = vpop.permute.xlu0 %430  ;;  %v1738_v57 = vpop.permute.xlu1 %440 }
  0x9b   :  { %v290_v48 = vpop.f32.mrf.mxu0  ;;  %v347_v59 = vpop.f32.mrf.mxu1 }
  0x9c   :  { %310 = vadd.xlane.f32.xlu0 %v290_v48  ;;  %v1740_v48 = vpop.permute.xlu2 %445  ;;  %v1742_v46 = vpop.permute.xlu0 %450 }
  0x9d   :  { %v1746_v51 = vpop.permute.xlu1 %515 }
  0xa3   :  { %v293_v50 = vpop.f32.mrf.mxu0 }
  0xa4   :  { %312 = vadd.xlane.f32.xlu1 %v293_v50  ;;  %367 = vadd.xlane.f32.xlu0 %v347_v59  ;;  %v484_v59 = vadd.s32 %v467_v14, %v1322_v2  ;;  %v1749_v50 = vpop.permute.xlu2 %525  ;;  %v1751_v13 = vpop.permute.xlu0 %530 }
  0xa5   :  { %v1755_v9 = vpop.permute.xlu1 %520 }
  0xab   :  { %v295_v11 = vpop.f32.mrf.mxu0 }
  0xac   :  { %314 = vadd.xlane.f32.xlu1 %v295_v11  ;;  %v468_v11 = vmul.u32 128, %v179_v10 }
  0xad   :  { %v1785_v5 = vpop.permute.xlu1 %455 }
  0xae   :  { %v485_v1 = vadd.s32 %v468_v11, %v1322_v2  ;;  %v1793_v11 = vld [vmem:[#allocation4 + $0x8] sm:$0xff]  }
  0xb0   :  { %v493_v44 = vadd.s32 1, %v485_v1 }
  0xb2   :  { %v1782_v47 = vcvt.s32.f32 %v493_v44  ;;  %v1824_v44 = vld [vmem:[#allocation4 + $0x10] sm:$0xff]  }
  0xb3   :  { %v298_v17 = vpop.f32.mrf.mxu0 }
  0xb4   :  { %316 = vadd.xlane.f32.xlu2 %v298_v17  ;;  %v1161_v14 = vadd.f32 -1.0, %v1782_v47  ;;  %vm709_vm2 = vcmp.le.f32.partialorder %v1782_v47, 1.0 }
  0xbb   :  { %v300_v30 = vpop.f32.mrf.mxu0 }
  0xbc   :  { %318 = vadd.xlane.f32.xlu2 %v300_v30 }
  0xc2   :  { %v398_v62 = vpop.f32.mrf.mxu2  ;;  %v403_v19 = vpop.f32.mrf.mxu3 }
  0xc3   :  { %v303_v42 = vpop.f32.mrf.mxu0 }
  0xc4   :  { %320 = vadd.xlane.f32.xlu0 %v303_v42 }
  0xca   :  { %v400_v29 = vpop.f32.mrf.mxu2 }
  0xcb   :  { %v305_v52 = vpop.f32.mrf.mxu0 }
  0xcc   :  { %322 = vadd.xlane.f32.xlu1 %v305_v52  ;;  %v488_v52 = vadd.s32 %v471_v34, %v1322_v2 }
  0xd4   :  { %535 = vperm.xlu2 %1196, %v82_v8   ;;  %v492_v8 = vadd.s32 1, %v484_v59 }
  0xd6   :  { %v1757_v17 = vcvt.s32.f32 %v492_v8  ;;  %v496_v8 = vadd.s32 1, %v488_v52 }
  0xd8   :  { %545 = vperm.xlu0 %1197, %v84_v18   ;;  %v470_v18 = vmul.u32 128, %v181_v26  ;;  %v1160_v39 = vadd.f32 -1.0, %v1757_v17  ;;  %vm708_vm0 = vcmp.le.f32.partialorder %v1757_v17, 1.0  ;;  %v1826_v32 = vcvt.s32.f32 %v496_v8 }
  0xda   :  { %v487_v24 = vadd.s32 %v470_v18, %v1322_v2 }
  0xdc   :  { %v495_v54 = vadd.s32 1, %v487_v24 }
  0xde   :  { %v1797_v1 = vcvt.s32.f32 %v495_v54 }
  0xe5   :  { %540 = vperm.xlu1 %1195, %v83_v22  }
 0x107   :  { %v309_v22 = vpop.xlane.xlu0 %308  ;;  %v366_v30 = vpop.xlane.xlu2 %365 }
 0x108   :  { %v399_v3 = vadd.f32 %v398_v62, %v309_v22  ;;  %v949_v10 = vadd.f32 %v1510_v60, %v366_v30  ;;  %v1795_v62 = vcvt.s32.f32 %v494_v27  ;;  %v1813_v22 = vmul.u32 128, %v184_v31 }
 0x109   :  { %v1817_v30 = vmul.u32 128, %v185_v36  ;;  %v1834_v31 = vadd.f32 -1.0, %v1797_v1 }
 0x10a   :  { %v1768_v42 = vadd.f32 %v421_v40, %v399_v3  ;;  %957 = vst.msk [vmem:[#allocation2] sm:$0xff] %vm2345_vm13, %v949_v10  ;;  %v405_v3 = vpop.f32.mrf.mxu3  ;;  %vm710_vm14 = vcmp.le.f32.partialorder %v1795_v62, 1.0 }
 0x10c   :  { %v556_v26 = vsub.f32 %v1757_v17, %v1768_v42  ;;  %v1776_v60 = vsub.f32 %v1768_v42, %v69_v33  ;;  %v71_v33 = vunpack.c.l.bf16 %v1793_v11 }
 0x10e   :  { %v1779_v35 = vadd.f32 %v556_v26, %v1734_v53  ;;  %v724_v45 = vsub.f32 %v1160_v39, %v1776_v60 }
 0x10f   :  { %v311_v6 = vpop.xlane.xlu0 %310 }
 0x110   :  { %1198 = vrcp.f32 %v1779_v35  ;;  %v401_v43 = vadd.f32 %v400_v29, %v311_v6  ;;  %v732_v40 = vadd.f32 %v724_v45, %v1734_v53  ;;  %v581_v26 = vand.u32 2147483647, %v1779_v35 }
 0x111   :  { %v583_v6 = vand.u32 2147483648, %v1779_v35  ;;  %vm577_vm3 = vweird.f32 %v1779_v35 }
 0x112   :  { %v1791_v59 = vadd.f32 %v426_v28, %v401_v43  ;;  %v1801_v7 = vsel %vm708_vm0, 1.0, %v732_v40  ;;  %v472_v28 = vmul.u32 128, %v183_v37  ;;  %v1830_v37 = vadd.f32 -1.0, %v1795_v62 }
 0x113   :  { %1200 = vrcp.f32 %v1801_v7  ;;  %vm1858_vm4 = vcmp.eq.f32.partialorder %v581_v26, 8.507059e+37  ;;  %v408_v26 = vpop.f32.mrf.mxu3  ;;  %vm761_vm12 = vweird.f32 %v1801_v7 }
 0x114   :  { %v557_v15 = vsub.f32 %v1782_v47, %v1791_v59  ;;  %v1806_v18 = vsub.f32 %v1791_v59, %v70_v55  ;;  %v548_v55 = vsub.f32 %v1734_v53, %v1768_v42 }
 0x116   :  { %v1199_v10 = vpop.eup %1198  ;;  %v1821_v34 = vadd.f32 %v557_v15, %v1746_v51  ;;  %v725_v39 = vsub.f32 %v1161_v14, %v1806_v18  ;;  %v489_v15 = vadd.s32 %v472_v28, %v1322_v2 }
 0x117   :  { %v313_v0 = vpop.xlane.xlu1 %312  ;;  %v573_v36 = vmul.f32 %v1199_v10, %v1779_v35  ;;  %v368_v20 = vpop.xlane.xlu0 %367  ;;  %vm578_vm15 = vweird.f32 %v1199_v10 }
 0x118   :  { %1202 = vrcp.f32 %v1821_v34  ;;  %v404_v24 = vadd.f32 %v403_v19, %v313_v0  ;;  %v950_v29 = vadd.f32 %v1533_v4, %v368_v20  ;;  %v733_v27 = vadd.f32 %v725_v39, %v1746_v51  ;;  %vm579_vm11 = vmor %vm577_vm3, %vm578_vm15 }
 0x119   :  { %v574_v52 = vsub.f32 1.0, %v573_v36  ;;  %v1201_v54 = vpop.eup %1200  ;;  %v1849_v19 = vadd.f32 -1.0, %v1826_v32  ;;  %v748_v4 = vsub.f32 %v1734_v53, %v1776_v60  ;;  %v584_v60 = vor.u32 1.1754944e-38, %v583_v6 }
 0x11a   :  { %v1846_v43 = vadd.f32 %v1736_v56, %v404_v24  ;;  %958 = vst.msk [vmem:[#allocation2 + $0x8] sm:$0xff] %vm2346_vm8, %v950_v29  ;;  %v757_v14 = vmul.f32 %v1201_v54, %v1801_v7  ;;  %v1866_v35 = vsel %vm709_vm2, 1.0, %v733_v27  ;;  %v765_v20 = vand.u32 2147483647, %v1801_v7 }
 0x11b   :  { %v575_v40 = vmul.f32 %v1199_v10, %v574_v52  ;;  %v767_v24 = vand.u32 2147483648, %v1801_v7  ;;  %1204 = vrcp.f32 %v1866_v35  ;;  %vm762_vm10 = vweird.f32 %v1201_v54 }
 0x11c   :  { %v558_v42 = vsub.f32 %v1795_v62, %v1846_v43  ;;  %v758_v39 = vsub.f32 1.0, %v757_v14  ;;  %v549_v27 = vsub.f32 %v1746_v51, %v1791_v59  ;;  %v497_v14 = vadd.s32 1, %v489_v15  ;;  %vm763_vm5 = vmor %vm761_vm12, %vm762_vm10 }
 0x11d   :  { %v576_v53 = vadd.f32 %v1199_v10, %v575_v40  ;;  %v598_v16 = vand.u32 2147483648, %v1821_v34  ;;  %vm766_vm1 = vcmp.eq.f32.partialorder %v765_v20, 8.507059e+37  ;;  %vm592_vm6 = vweird.f32 %v1821_v34 }
 0x11e   :  { %v1868_v0 = vpop.eup %1202  ;;  %v1871_v36 = vadd.f32 %v558_v42, %v1755_v9  ;;  %v759_v52 = vmul.f32 %v1201_v54, %v758_v39  ;;  %v768_v39 = vor.u32 1.1754944e-38, %v767_v24  ;;  %vm776_vm3 = vweird.f32 %v1866_v35 }
 0x11f   :  { %v315_v28 = vpop.xlane.xlu1 %314  ;;  %v580_v29 = vsel %vm579_vm11, %v1199_v10, %v576_v53  ;;  %v588_v6 = vmul.f32 %v1868_v0, %v1821_v34  ;;  %v1885_v10 = vsub.f32 %v1846_v43, %v71_v33  ;;  %vm593_vm7 = vweird.f32 %v1868_v0 }
 0x120   :  { %1206 = vrcp.f32 %v1871_v36  ;;  %v406_v40 = vadd.f32 %v405_v3, %v315_v28  ;;  %v585_v42 = vsel %vm1858_vm4, %v584_v60, %v580_v29  ;;  %v760_v8 = vadd.f32 %v1201_v54, %v759_v52  ;;  %vm1910_vm9 = vmor %vm592_vm6, %vm593_vm7 }
 0x121   :  { %v589_v45 = vsub.f32 1.0, %v588_v6  ;;  %v1205_v7 = vpop.eup %1204  ;;  %v586_v15 = vmul.f32 %v585_v42, %v548_v55  ;;  %v596_v28 = vand.u32 2147483647, %v1821_v34  ;;  %v599_v29 = vor.u32 1.1754944e-38, %v598_v16  ;;  %v53_v34 = vld [vmem:[%s2305_s1] sm:$0xff] }
 0x122   :  { %v1888_v53 = vadd.f32 %v1731_v38, %v406_v40  ;;  %v764_v3 = vsel %vm763_vm5, %v1201_v54, %v760_v8  ;;  %v772_v54 = vmul.f32 %v1205_v7, %v1866_v35  ;;  %v780_v55 = vand.u32 2147483647, %v1866_v35 }
 0x123   :  { %v590_v56 = vmul.f32 %v1868_v0, %v589_v45  ;;  %v769_v60 = vsel %vm766_vm1, %v768_v39, %v764_v3  ;;  %v726_v45 = vsub.f32 %v1830_v37, %v1885_v10  ;;  %v782_v42 = vand.u32 2147483648, %v1866_v35 }
 0x124   :  { %v559_v33 = vsub.f32 %v1797_v1, %v1888_v53  ;;  %v770_v38 = vmul.f32 %v769_v60, %v748_v4  ;;  %v773_v40 = vsub.f32 1.0, %v772_v54  ;;  %v692_v3 = vsub.f32 1.0, %v586_v15 }
 0x125   :  { %v591_v24 = vadd.f32 %v1868_v0, %v590_v56  ;;  %vm777_vm13 = vweird.f32 %v1205_v7  ;;  %vm597_vm8 = vcmp.eq.f32.partialorder %v596_v28, 8.507059e+37  ;;  %v1934_v4 = vcvt.s32.f32 %v497_v14 }
 0x126   :  { %v1900_v8 = vpop.eup %1206  ;;  %v1905_v20 = vadd.f32 %v559_v33, %v1749_v50  ;;  %v876_v6 = vsub.f32 1.0, %v770_v38  ;;  %v410_v33 = vpop.f32.mrf.mxu3  ;;  %v774_v60 = vmul.f32 %v1205_v7, %v773_v40  ;;  %v749_v28 = vsub.f32 %v1746_v51, %v1806_v18 }
 0x127   :  { %v317_v52 = vpop.xlane.xlu2 %316  ;;  %v603_v37 = vmul.f32 %v1900_v8, %v1871_v36  ;;  %v595_v16 = vsel %vm1910_vm9, %v1868_v0, %v591_v24  ;;  %vm781_vm15 = vcmp.eq.f32.partialorder %v780_v55, 8.507059e+37  ;;  %v2351_v18 = vunpack.c.h.bf16 %v1793_v11 }
 0x128   :  { %v409_v39 = vadd.f32 %v408_v26, %v317_v52  ;;  %1208 = vrcp.f32 %v1905_v20  ;;  %v884_v56 = vsel %vm708_vm0, 0.0, %v876_v6  ;;  %v600_v0 = vsel %vm597_vm8, %v599_v29, %v595_v16  ;;  %vm778_vm0 = vmor %vm776_vm3, %vm777_vm13 }
 0x129   :  { %v604_v38 = vsub.f32 1.0, %v603_v37  ;;  %v892_v15 = vsub.f32 %v692_v3, %v884_v56  ;;  %v775_v24 = vadd.f32 %v1205_v7, %v774_v60  ;;  %v734_v52 = vadd.f32 %v726_v45, %v1755_v9 }
 0x12a   :  { %v1927_v26 = vadd.f32 %v1738_v57, %v409_v39  ;;  %v783_v57 = vor.u32 1.1754944e-38, %v782_v42  ;;  %v601_v14 = vmul.f32 %v600_v0, %v549_v27  ;;  %vm608_vm4 = vweird.f32 %v1900_v8 }
 0x12b   :  { %v605_v54 = vmul.f32 %v1900_v8, %v604_v38  ;;  %v908_v6 = vmul.f32 %v892_v15, %v53_v34  ;;  %v779_v40 = vsel %vm778_vm0, %v1205_v7, %v775_v24  ;;  %v1941_v35 = vsel %vm710_vm14, 1.0, %v734_v52 }
 0x12c   :  { %v560_v17 = vsub.f32 %v1826_v32, %v1927_v26  ;;  %v784_v29 = vsel %vm781_vm15, %v783_v57, %v779_v40  ;;  %1210 = vrcp.f32 %v1941_v35  ;;  %v1955_v7 = vsub.f32 %v1888_v53, %v2351_v18 }
 0x12d   :  { %916 = vadd.xlane.f32.xlu2 %v908_v6  ;;  %v785_v37 = vmul.f32 %v784_v29, %v749_v28  ;;  %v606_v39 = vadd.f32 %v1900_v8, %v605_v54  ;;  %v1961_v51 = vadd.s32 %v1813_v22, %v1322_v2  ;;  %v611_v59 = vand.u32 2147483647, %v1871_v36 }
 0x12e   :  { %v1944_v45 = vadd.f32 %v560_v17, %v1751_v13  ;;  %v1950_v42 = vpop.eup %1208  ;;  %v613_v27 = vand.u32 2147483648, %v1871_v36  ;;  %v550_v11 = vsub.f32 %v1755_v9, %v1846_v43  ;;  %v1968_v34 = vadd.f32 -1.0, %v1934_v4  ;;  %v1990_v15 = vpop.f32.mrf.mxu3 }
 0x12f   :  { %v319_v55 = vpop.xlane.xlu2 %318  ;;  %v877_v16 = vsub.f32 1.0, %v785_v37  ;;  %vm607_vm11 = vweird.f32 %v1871_v36  ;;  %v693_v22 = vsub.f32 1.0, %v601_v14  ;;  %v618_v60 = vmul.f32 %v1950_v42, %v1905_v20  ;;  %v54_v36 = vld [vmem:[%s2305_s1 + $0x8] sm:$0xff] }
 0x130   :  { %v411_v3 = vadd.f32 %v410_v33, %v319_v55  ;;  %1212 = vrcp.f32 %v1944_v45  ;;  %vm1975_vm10 = vmor %vm607_vm11, %vm608_vm4  ;;  %v551_v43 = vsub.f32 %v1749_v50, %v1888_v53  ;;  %v727_v38 = vsub.f32 %v1834_v31, %v1955_v7 }
 0x131   :  { %v610_v0 = vsel %vm1975_vm10, %v1900_v8, %v606_v39  ;;  %v2354_v54 = vunpack.c.l.bf16 %v1824_v44  ;;  %vm612_vm12 = vcmp.eq.f32.partialorder %v611_v59, 8.507059e+37  ;;  %v614_v52 = vor.u32 1.1754944e-38, %v613_v27 }
 0x132   :  { %v1973_v56 = vadd.f32 %v1740_v48, %v411_v3  ;;  %v885_v48 = vsel %vm709_vm2, 0.0, %v877_v16  ;;  %v1211_v24 = vpop.eup %1210  ;;  %v750_v17 = vsub.f32 %v1755_v9, %v1885_v10  ;;  %vm791_vm2 = vweird.f32 %v1941_v35 }
 0x133   :  { %v1998_v53 = vsub.f32 %v1927_v26, %v2354_v54  ;;  %v893_v31 = vsub.f32 %v693_v22, %v885_v48  ;;  %v787_v47 = vmul.f32 %v1211_v24, %v1941_v35  ;;  %v619_v6 = vsub.f32 1.0, %v618_v60  ;;  %v2028_v48 = vld [vmem:[#allocation4 + $0x18] sm:$0xff]  }
 0x134   :  { %v561_v8 = vsub.f32 %v1934_v4, %v1973_v56  ;;  %v615_v28 = vsel %vm612_vm12, %v614_v52, %v610_v0  ;;  %v628_v40 = vand.u32 2147483648, %v1905_v20  ;;  %vm623_vm5 = vweird.f32 %v1950_v42 }
 0x135   :  { %v909_v57 = vmul.f32 %v893_v31, %v54_v36  ;;  %v788_v29 = vsub.f32 1.0, %v787_v47  ;;  %v620_v18 = vmul.f32 %v1950_v42, %v619_v6  ;;  %v626_v9 = vand.u32 2147483647, %v1905_v20 }
 0x136   :  { %v2012_v10 = vpop.eup %1212  ;;  %v795_v37 = vand.u32 2147483647, %v1941_v35  ;;  %v797_v39 = vand.u32 2147483648, %v1941_v35  ;;  %vm622_vm1 = vweird.f32 %v1905_v20  ;;  %vm792_vm6 = vweird.f32 %v1211_v24 }
 0x137   :  { %v2007_v14 = vpop.permute.xlu2 %535  ;;  %918 = vadd.xlane.f32.xlu1 %v909_v57  ;;  %v789_v3 = vmul.f32 %v1211_v24, %v788_v29  ;;  %v621_v59 = vadd.f32 %v1950_v42, %v620_v18  ;;  %vm711_vm7 = vcmp.le.f32.partialorder %v1797_v1, 1.0  ;;  %v616_v27 = vmul.f32 %v615_v28, %v550_v11  ;;  %vm624_vm9 = vmor %vm622_vm1, %vm623_vm5 }
 0x138   :  { %v2015_v55 = vadd.f32 %v561_v8, %v2007_v14  ;;  %v491_v16 = vadd.s32 %v1817_v30, %v1322_v2  ;;  %v629_v22 = vor.u32 1.1754944e-38, %v628_v40  ;;  %v735_v33 = vadd.f32 %v727_v38, %v1749_v50  ;;  %vm793_vm8 = vmor %vm791_vm2, %vm792_vm6  ;;  %v321_v40 = vpop.xlane.xlu0 %320 }
 0x139   :  { %v790_v60 = vadd.f32 %v1211_v24, %v789_v3  ;;  %v625_v36 = vsel %vm624_vm9, %v1950_v42, %v621_v59  ;;  %vm627_vm13 = vcmp.eq.f32.partialorder %v626_v9, 8.507059e+37  ;;  %v633_v20 = vmul.f32 %v2012_v10, %v1944_v45  ;;  %v415_v42 = vpop.f32.mrf.mxu3 }
 0x13a   :  { %1214 = vrcp.f32 %v2015_v55  ;;  %v798_v11 = vor.u32 1.1754944e-38, %v797_v39  ;;  %v630_v2 = vsel %vm627_vm13, %v629_v22, %v625_v36  ;;  %v2035_v30 = vsel %vm711_vm7, 1.0, %v735_v33 }
 0x13b   :  { %v794_v38 = vsel %vm793_vm8, %v1211_v24, %v790_v60  ;;  %vm796_vm3 = vcmp.eq.f32.partialorder %v795_v37, 8.507059e+37  ;;  %v2037_v0 = vmul.f32 %v630_v2, %v551_v43  ;;  %1216 = vrcp.f32 %v2035_v30 }
 0x13c   :  { %v728_v54 = vsub.f32 %v1849_v19, %v1998_v53  ;;  %v2355_v31 = vunpack.c.h.bf16 %v1824_v44  ;;  %v799_v52 = vsel %vm796_vm3, %v798_v11, %v794_v38  ;;  %v634_v47 = vsub.f32 1.0, %v633_v20 }
 0x13d   :  { %v75_v6 = vunpack.c.l.bf16 %v2028_v48  ;;  %v498_v24 = vadd.s32 1, %v1961_v51  ;;  %v800_v8 = vmul.f32 %v799_v52, %v750_v17  ;;  %v499_v57 = vadd.s32 1, %v491_v16 }
 0x13e   :  { %v2045_v35 = vsub.f32 %v1973_v56, %v2355_v31  ;;  %v552_v28 = vsub.f32 %v1751_v13, %v1927_v26  ;;  %v694_v29 = vsub.f32 1.0, %v616_v27  ;;  %v635_v44 = vmul.f32 %v2012_v10, %v634_v47  ;;  %v55_v27 = vld [vmem:[%s2305_s1 + $0x10] sm:$0xff] }
 0x13f   :  { %v323_v43 = vpop.xlane.xlu1 %322  ;;  %v878_v18 = vsub.f32 1.0, %v800_v8  ;;  %vm638_vm0 = vweird.f32 %v2012_v10  ;;  %v641_v9 = vand.u32 2147483647, %v1944_v45  ;;  %v643_v37 = vand.u32 2147483648, %v1944_v45 }
 0x140   :  { %v416_v19 = vadd.f32 %v415_v42, %v323_v43  ;;  %v2055_v39 = vpop.eup %1214  ;;  %v729_v51 = vsub.f32 %v1968_v34, %v2045_v35  ;;  %v636_v17 = vadd.f32 %v2012_v10, %v635_v44  ;;  %vm712_vm15 = vcmp.le.f32.partialorder %v1826_v32, 1.0 }
 0x141   :  { %v736_v26 = vadd.f32 %v728_v54, %v1751_v13  ;;  %v1217_v3 = vpop.eup %1216  ;;  %v414_v59 = vadd.f32 %v1990_v15, %v321_v40  ;;  %v886_v16 = vsel %vm710_vm14, 0.0, %v878_v18  ;;  %v2068_v22 = vcvt.s32.f32 %v499_v57 }
 0x142   :  { %vm637_vm4 = vweird.f32 %v1944_v45  ;;  %v894_v34 = vsub.f32 %v694_v29, %v886_v16  ;;  %v2072_v33 = vadd.f32 %v1785_v5, %v416_v19  ;;  %v802_v60 = vmul.f32 %v1217_v3, %v2035_v30 }
 0x143   :  { %vm639_vm11 = vmor %vm637_vm4, %vm638_vm0  ;;  %v644_v15 = vor.u32 1.1754944e-38, %v643_v37  ;;  %vm642_vm10 = vcmp.eq.f32.partialorder %v641_v9, 8.507059e+37  ;;  %v2080_v62 = vsel %vm712_vm15, 1.0, %v736_v26  ;;  %v648_v45 = vmul.f32 %v2055_v39, %v2015_v55  ;;  %v2114_v9 = vpop.f32.mrf.mxu1 }
 0x144   :  { %v640_v36 = vsel %vm639_vm11, %v2012_v10, %v636_v17  ;;  %v2084_v20 = vcvt.s32.f32 %v498_v24  ;;  %v910_v5 = vmul.f32 %v894_v34, %v55_v27  ;;  %v803_v11 = vsub.f32 1.0, %v802_v60 }
 0x145   :  { %v645_v2 = vsel %vm642_vm10, %v644_v15, %v640_v36  ;;  %v76_v38 = vunpack.c.h.bf16 %v2028_v48  ;;  %v812_v42 = vand.u32 2147483648, %v2035_v30  ;;  %1218 = vrcp.f32 %v2080_v62  ;;  %v56_v36 = vld [vmem:[%s2305_s1 + $0x18] sm:$0xff] }
 0x146   :  { %v2088_v54 = vmul.f32 %v645_v2, %v552_v28  ;;  %v2092_v10 = vadd.f32 %v1742_v46, %v414_v59  ;;  %920 = vadd.xlane.f32.xlu0 %v910_v5  ;;  %v804_v31 = vmul.f32 %v1217_v3, %v803_v11  ;;  %vm807_vm14 = vweird.f32 %v1217_v3 }
 0x147   :  { %v810_v52 = vand.u32 2147483647, %v2035_v30  ;;  %v553_v47 = vsub.f32 %v2007_v14, %v1973_v56  ;;  %v737_v24 = vadd.f32 %v729_v51, %v2007_v14  ;;  %v563_v8 = vsub.f32 %v2068_v22, %v2072_v33 }
 0x148   :  { %v649_v57 = vsub.f32 1.0, %v648_v45  ;;  %v753_v43 = vsub.f32 %v2007_v14, %v2045_v35  ;;  %v751_v46 = vsub.f32 %v1749_v50, %v1955_v7  ;;  %v805_v28 = vadd.f32 %v1217_v3, %v804_v31  ;;  %v58_v35 = vld [vmem:[%s2305_s1 + $0x28] sm:$0xff] }
 0x149   :  { %vm806_vm12 = vweird.f32 %v2035_v30  ;;  %v2108_v29 = vsub.f32 %v2072_v33, %v76_v38  ;;  %v813_v19 = vor.u32 1.1754944e-38, %v812_v42  ;;  %v1167_v44 = vadd.f32 -1.0, %v2068_v22 }
 0x14a   :  { %v2105_v40 = vpop.permute.xlu0 %545  ;;  %vm808_vm2 = vmor %vm806_vm12, %vm807_vm14  ;;  %v562_v50 = vsub.f32 %v2084_v20, %v2092_v10  ;;  %v2121_v7 = vsub.f32 %v2092_v10, %v75_v6  ;;  %vm811_vm5 = vcmp.eq.f32.partialorder %v810_v52, 8.507059e+37  ;;  %v650_v17 = vmul.f32 %v2055_v39, %v649_v57 }
 0x14b   :  { %v2112_v18 = vadd.f32 %v563_v8, %v2105_v40  ;;  %v809_v30 = vsel %vm808_vm2, %v1217_v3, %v805_v28  ;;  %v1219_v37 = vpop.eup %1218  ;;  %vm713_vm1 = vcmp.le.f32.partialorder %v1934_v4, 1.0  ;;  %v695_v26 = vsub.f32 1.0, %v2037_v0 }
 0x14c   :  { %v814_v51 = vsel %vm811_vm5, %v813_v19, %v809_v30  ;;  %v752_v27 = vsub.f32 %v1751_v13, %v1998_v53  ;;  %v817_v48 = vmul.f32 %v1219_v37, %v2080_v62  ;;  %v731_v6 = vsub.f32 %v1167_v44, %v2108_v29 }
 0x14d   :  { %1220 = vrcp.f32 %v2112_v18  ;;  %v815_v59 = vmul.f32 %v814_v51, %v751_v46  ;;  %vm821_vm6 = vweird.f32 %v2080_v62  ;;  %v825_v3 = vand.u32 2147483647, %v2080_v62  ;;  %v2172_v46 = vpop.f32.mrf.mxu1 }
 0x14e   :  { %v2135_v16 = vsel %vm713_vm1, 1.0, %v737_v24  ;;  %v818_v60 = vsub.f32 1.0, %v817_v48  ;;  %v827_v0 = vand.u32 2147483648, %v2080_v62  ;;  %v739_v13 = vadd.f32 %v731_v6, %v2105_v40 }
 0x14f   :  { %v879_v34 = vsub.f32 1.0, %v815_v59  ;;  %1222 = vrcp.f32 %v2135_v16  ;;  %v651_v53 = vadd.f32 %v2055_v39, %v650_v17  ;;  %vm653_vm9 = vweird.f32 %v2055_v39 }
 0x150   :  { %v658_v15 = vand.u32 2147483648, %v2015_v55  ;;  %v819_v5 = vmul.f32 %v1219_v37, %v818_v60  ;;  %vm822_vm13 = vweird.f32 %v1219_v37  ;;  %vm715_vm8 = vcmp.le.f32.partialorder %v2068_v22, 1.0 }
 0x151   :  { %v887_v45 = vsel %vm711_vm7, 0.0, %v879_v34  ;;  %vm652_vm3 = vweird.f32 %v2015_v55  ;;  %v656_v38 = vand.u32 2147483647, %v2015_v55  ;;  %v1166_v42 = vadd.f32 -1.0, %v2084_v20  ;;  %vm823_vm4 = vmor %vm821_vm6, %vm822_vm13 }
 0x152   :  { %v895_v2 = vsub.f32 %v695_v26, %v887_v45  ;;  %v696_v31 = vsub.f32 1.0, %v2088_v54  ;;  %v820_v52 = vadd.f32 %v1219_v37, %v819_v5  ;;  %vm826_vm0 = vcmp.eq.f32.partialorder %v825_v3, 8.507059e+37  ;;  %vm2157_vm7 = vmor %vm652_vm3, %vm653_vm9 }
 0x153   :  { %v2149_v11 = vpop.eup %1220  ;;  %v828_v55 = vor.u32 1.1754944e-38, %v827_v0  ;;  %v655_v54 = vsel %vm2157_vm7, %v2055_v39, %v651_v53  ;;  %v2170_v57 = vsel %vm715_vm8, 1.0, %v739_v13  ;;  %v659_v44 = vor.u32 1.1754944e-38, %v658_v15  ;;  %v57_v15 = vld [vmem:[%s2305_s1 + $0x20] sm:$0xff] }
 0x154   :  { %v678_v24 = vmul.f32 %v2149_v11, %v2112_v18  ;;  %v911_v8 = vmul.f32 %v895_v2, %v56_v36  ;;  %v824_v19 = vsel %vm823_vm4, %v1219_v37, %v820_v52  ;;  %1224 = vrcp.f32 %v2170_v57 }
 0x155   :  { %v1223_v28 = vpop.eup %1222  ;;  %v829_v62 = vsel %vm826_vm0, %v828_v55, %v824_v19  ;;  %vm657_vm11 = vcmp.eq.f32.partialorder %v656_v38, 8.507059e+37  ;;  %v730_v17 = vsub.f32 %v1166_v42, %v2121_v7  ;;  %v840_v48 = vand.u32 2147483647, %v2135_v16 }
 0x156   :  { %v679_v30 = vsub.f32 1.0, %v678_v24  ;;  %922 = vadd.xlane.f32.xlu2 %v911_v8  ;;  %v832_v51 = vmul.f32 %v1223_v28, %v2135_v16  ;;  %v830_v26 = vmul.f32 %v829_v62, %v752_v27  ;;  %v660_v59 = vsel %vm657_vm11, %v659_v44, %v655_v54  ;;  %v2214_v8 = vpop.f32.mrf.mxu1 }
 0x157   :  { %v2177_v39 = vpop.permute.xlu1 %540  ;;  %v842_v3 = vand.u32 2147483648, %v2135_v16  ;;  %v688_v13 = vand.u32 2147483648, %v2112_v18  ;;  %vm714_vm10 = vcmp.le.f32.partialorder %v2084_v20, 1.0  ;;  %v661_v27 = vmul.f32 %v660_v59, %v553_v47 }
 0x158   :  { %v2181_v6 = vadd.f32 %v562_v50, %v2177_v39  ;;  %v833_v37 = vsub.f32 1.0, %v832_v51  ;;  %v738_v34 = vadd.f32 %v730_v17, %v2177_v39  ;;  %v680_v60 = vmul.f32 %v2149_v11, %v679_v30 }
 0x159   :  { %v880_v0 = vsub.f32 1.0, %v830_v26  ;;  %vm837_vm14 = vweird.f32 %v1223_v28  ;;  %vm682_vm12 = vweird.f32 %v2112_v18  ;;  %vm836_vm2 = vweird.f32 %v2135_v16 }
 0x15a   :  { %1226 = vrcp.f32 %v2181_v6  ;;  %v834_v50 = vmul.f32 %v1223_v28, %v833_v37  ;;  %v1225_v53 = vpop.eup %1224  ;;  %v681_v45 = vadd.f32 %v2149_v11, %v680_v60  ;;  %vm683_vm5 = vweird.f32 %v2149_v11  ;;  %vm838_vm6 = vmor %vm836_vm2, %vm837_vm14 }
 0x15b   :  { %v888_v36 = vsel %vm712_vm15, 0.0, %v880_v0  ;;  %v862_v5 = vmul.f32 %v1225_v53, %v2170_v57  ;;  %v2204_v2 = vsel %vm714_vm10, 1.0, %v738_v34  ;;  %vm841_vm9 = vcmp.eq.f32.partialorder %v840_v48, 8.507059e+37  ;;  %vm2209_vm15 = vmor %vm682_vm12, %vm683_vm5 }
 0x15c   :  { %v896_v56 = vsub.f32 %v696_v31, %v888_v36  ;;  %v835_v47 = vadd.f32 %v1223_v28, %v834_v50  ;;  %v843_v38 = vor.u32 1.1754944e-38, %v842_v3  ;;  %v686_v32 = vand.u32 2147483647, %v2112_v18 }
 0x15d   :  { %v689_v42 = vor.u32 1.1754944e-38, %v688_v13  ;;  %v863_v31 = vsub.f32 1.0, %v862_v5  ;;  %v870_v24 = vand.u32 2147483647, %v2170_v57  ;;  %v685_v19 = vsel %vm2209_vm15, %v2149_v11, %v681_v45 }
 0x15e   :  { %v912_v52 = vmul.f32 %v896_v56, %v57_v15  ;;  %v839_v16 = vsel %vm838_vm6, %v1223_v28, %v835_v47  ;;  %v872_v44 = vand.u32 2147483648, %v2170_v57  ;;  %1228 = vrcp.f32 %v2204_v2  ;;  %v357_v36 = vpop.f32.mrf.mxu1 }
 0x15f   :  { %v844_v54 = vsel %vm841_vm9, %v843_v38, %v839_v16  ;;  %v864_v28 = vmul.f32 %v1225_v53, %v863_v31  ;;  %vm867_vm13 = vweird.f32 %v1225_v53  ;;  %v555_v62 = vsub.f32 %v2105_v40, %v2072_v33  ;;  %v60_v38 = vld [vmem:[%s2305_s1 + $0x38] sm:$0xff] }
 0x160   :  { %v1227_v55 = vpop.eup %1226  ;;  %924 = vadd.xlane.f32.xlu1 %v912_v52  ;;  %v845_v18 = vmul.f32 %v844_v54, %v753_v43  ;;  %vm687_vm3 = vcmp.eq.f32.partialorder %v686_v32, 8.507059e+37  ;;  %vm866_vm0 = vweird.f32 %v2170_v57  ;;  %v755_v59 = vsub.f32 %v2105_v40, %v2108_v29 }
 0x161   :  { %v663_v30 = vmul.f32 %v1227_v55, %v2181_v6  ;;  %v690_v51 = vsel %vm687_vm3, %v689_v42, %v685_v19  ;;  %v865_v17 = vadd.f32 %v1225_v53, %v864_v28  ;;  %v697_v48 = vsub.f32 1.0, %v661_v27  ;;  %vm868_vm7 = vmor %vm866_vm0, %vm867_vm13 }
 0x162   :  { %v881_v11 = vsub.f32 1.0, %v845_v18  ;;  %vm871_vm4 = vcmp.eq.f32.partialorder %v870_v24, 8.507059e+37  ;;  %v873_v14 = vor.u32 1.1754944e-38, %v872_v44  ;;  %v673_v37 = vand.u32 2147483648, %v2181_v6 }
 0x163   :  { %v664_v26 = vsub.f32 1.0, %v663_v30  ;;  %v869_v43 = vsel %vm868_vm7, %v1225_v53, %v865_v17  ;;  %v691_v60 = vmul.f32 %v690_v51, %v555_v62  ;;  %vm668_vm11 = vweird.f32 %v1227_v55 }
 0x164   :  { %v889_v33 = vsel %vm713_vm1, 0.0, %v881_v11  ;;  %v1229_v3 = vpop.eup %1228  ;;  %v874_v0 = vsel %vm871_vm4, %v873_v14, %v869_v43  ;;  %vm667_vm14 = vweird.f32 %v2181_v6  ;;  %v671_v50 = vand.u32 2147483647, %v2181_v6  ;;  %v902_v43 = vld [vmem:[#allocation3 + $0x10] sm:$0xff] }
 0x165   :  { %v665_v57 = vmul.f32 %v1227_v55, %v664_v26  ;;  %v897_v34 = vsub.f32 %v697_v48, %v889_v33  ;;  %v875_v40 = vmul.f32 %v874_v0, %v755_v59  ;;  %v847_v13 = vmul.f32 %v1229_v3, %v2204_v2  ;;  %vm2239_vm1 = vmor %vm667_vm14, %vm668_vm11  ;;  %v901_v26 = vld [vmem:[#allocation3 + $0x8] sm:$0xff]  ;;  %v903_v0 = vld [vmem:[#allocation3 + $0x18] sm:$0xff] }
 0x166   :  { %v699_v45 = vsub.f32 1.0, %v691_v60  ;;  %v674_v47 = vor.u32 1.1754944e-38, %v673_v37  ;;  %v857_v5 = vand.u32 2147483648, %v2204_v2  ;;  %vm852_vm12 = vweird.f32 %v1229_v3  ;;  %v360_v30 = vpop.f32.mrf.mxu1 }
 0x167   :  { %v666_v29 = vadd.f32 %v1227_v55, %v665_v57  ;;  %v913_v27 = vmul.f32 %v897_v34, %v58_v35  ;;  %v883_v4 = vsub.f32 1.0, %v875_v40  ;;  %v848_v15 = vsub.f32 1.0, %v847_v13 }
 0x168   :  { %v855_v42 = vand.u32 2147483647, %v2204_v2  ;;  %vm672_vm2 = vcmp.eq.f32.partialorder %v671_v50, 8.507059e+37  ;;  %vm851_vm5 = vweird.f32 %v2204_v2  ;;  %v554_v31 = vsub.f32 %v2177_v39, %v2092_v10  ;;  %v59_v10 = vld [vmem:[%s2305_s1 + $0x30] sm:$0xff]  ;;  %s1296_s1 = smov [#allocation7]  }
 0x169   :  { %926 = vadd.xlane.f32.xlu2 %v913_v27  ;;  %v670_v56 = vsel %vm2239_vm1, %v1227_v55, %v666_v29  ;;  %v891_v6 = vsel %vm715_vm8, 0.0, %v883_v4  ;;  %v849_v32 = vmul.f32 %v1229_v3, %v848_v15  ;;  %vm853_vm6 = vmor %vm851_vm5, %vm852_vm12  ;;  %v858_v55 = vor.u32 1.1754944e-38, %v857_v5  ;;  %s1076_s21 = sshll.u32 %s1296_s1, 4  ;;  %s1077_s21 = int_to_ptr.vmem [resolvable:$true] %s1076_s21 }
 0x16a   :  { %v899_v52 = vsub.f32 %v699_v45, %v891_v6  ;;  %v675_v16 = vsel %vm672_vm2, %v674_v47, %v670_v56  ;;  %v754_v22 = vsub.f32 %v2177_v39, %v2121_v7  ;;  %vm856_vm8 = vcmp.eq.f32.partialorder %v855_v42, 8.507059e+37  ;;  %v905_v56 = vld [vmem:[#allocation3 + $0x28] sm:$0xff]  ;;  %v907_v42 = vld [vmem:[#allocation3 + $0x38] sm:$0xff] }
 0x16b   :  { %v850_v1 = vadd.f32 %v1229_v3, %v849_v32  ;;  %v676_v19 = vmul.f32 %v675_v16, %v554_v31  ;;  %vm2362_vm9 = vcmask 7168   ;;  %v1044_v4 = vrot.slane %v1709_v41, 4 }
 0x16c   :  { %v915_v24 = vmul.f32 %v899_v52, %v60_v38  ;;  %vm2364_vm15 = vmmov %vm2362_vm9 }
 0x16d   :  { %v854_v54 = vsel %vm853_vm6, %v1229_v3, %v850_v1  ;;  %v698_v2 = vsub.f32 1.0, %v676_v19  ;;  %vm2365_vm13 = vmmov %vm2362_vm9  ;;  %v1045_v45 = vadd.f32 %v1044_v4, %v1709_v41  ;;  %v1232_v41 = vld [vmem:[#allocation2 + $0x10] sm:$0xff] }
 0x16e   :  { %930 = vadd.xlane.f32.xlu1 %v915_v24  ;;  %v859_v44 = vsel %vm856_vm8, %v858_v55, %v854_v54  ;;  %v362_v39 = vpop.f32.mrf.mxu1  ;;  %vm2366_vm3 = vmmov %vm2362_vm9 }
 0x16f   :  { %v860_v18 = vmul.f32 %v859_v44, %v754_v22  ;;  %vm2367_vm0 = vmmov %vm2366_vm3  ;;  %v1046_v47 = vrot.slane %v1045_v45, 2 }
 0x170   :  { %vm2368_vm7 = vmmov %vm2367_vm0 }
 0x171   :  { %369 = vadd.xlane.f32.xlu2 %v2114_v9  ;;  %v882_v28 = vsub.f32 1.0, %v860_v18  ;;  %v900_v9 = vld [vmem:[#allocation3] sm:$0xff]  ;;  %vm2369_vm4 = vmmov %vm2367_vm0 }
 0x172   :  { %vm2370_vm11 = vmmov %vm2367_vm0 }
 0x173   :  { %v890_v62 = vsel %vm714_vm10, 0.0, %v882_v28  ;;  %vm2363_vm10 = vmmov %vm2362_vm9 }
 0x174   :  { %v898_v11 = vsub.f32 %v698_v2, %v890_v62  ;;  %vm2371_vm14 = vmmov %vm2367_vm0  ;;  %v1233_v62 = vld [vmem:[#allocation2 + $0x20] sm:$0xff] }
 0x175   :  { %vm2372_vm1 = vmmov %vm2367_vm0 }
 0x176   :  { %v914_v7 = vmul.f32 %v898_v11, %v59_v10  ;;  %373 = vadd.xlane.f32.xlu1 %v2214_v8  ;;  %vm2373_vm12 = vmmov %vm2367_vm0 }
 0x177   :  { %vm2374_vm2 = vmmov %vm2367_vm0 }
 0x178   :  { %928 = vadd.xlane.f32.xlu0 %v914_v7  ;;  %vm2375_vm5 = vmmov %vm2367_vm0 }
 0x179   :  { %375 = vadd.xlane.f32.xlu2 %v357_v36  ;;  %vm2376_vm6 = vmmov %vm2367_vm0 }
 0x17a   :  { %vm2377_vm8 = vmmov %vm2367_vm0 }
 0x17e   :  { %379 = vadd.xlane.f32.xlu1 %v362_v39 }
 0x180   :  { %371 = vadd.xlane.f32.xlu0 %v2172_v46 }
 0x188   :  { %377 = vadd.xlane.f32.xlu0 %v360_v30  ;;  %v906_v30 = vld [vmem:[#allocation3 + $0x30] sm:$0xff] }
 0x1a0   :  { %v917_v51 = vpop.xlane.xlu2 %916 }
 0x1a1   :  { %v932_v17 = vadd.f32 %v917_v51, %v900_v9  ;;  %v1234_v51 = vld [vmem:[#allocation2 + $0x28] sm:$0xff] }
 0x1a3   :  { %941 = vst.msk [vmem:[#allocation3] sm:$0xff] %vm2362_vm9, %v932_v17  ;;  %vm2378_vm9 = vmmov %vm2367_vm0 }
 0x1aa   :  { %v919_v59 = vpop.xlane.xlu1 %918  ;;  %v968_v48 = vld [vmem:[#allocation3] sm:$0xff] }
 0x1ab   :  { %v933_v20 = vadd.f32 %v919_v59, %v901_v26  ;;  %v1000_v8 = vmul.f32 %v1502_v58, %v968_v48  ;;  %v1235_v59 = vld [vmem:[#allocation2 + $0x38] sm:$0xff] }
 0x1ad   :  { %942 = vst.msk [vmem:[#allocation3 + $0x8] sm:$0xff] %vm2363_vm10, %v933_v20  ;;  %v1008_v33 = vsel %vm2364_vm15, %v1000_v8, 0.0  ;;  %vm2379_vm10 = vmmov %vm2367_vm0 }
 0x1ae   :  { %vm2380_vm15 = vmmov %vm2367_vm0 }
 0x1b4   :  { %v969_v14 = vld [vmem:[#allocation3 + $0x8] sm:$0xff] }
 0x1b5   :  { %v1001_v35 = vmul.f32 %v1472_v49, %v969_v14  ;;  %v904_v49 = vld [vmem:[#allocation3 + $0x20] sm:$0xff] }
 0x1b7   :  { %v1009_v46 = vsel %vm2365_vm13, %v1001_v35, 0.0  ;;  %v1236_v35 = vld [vmem:[#allocation2 + $0x18] sm:$0xff]  ;;  %vm2381_vm13 = vmmov %vm2367_vm0 }
 0x1b8   :  { %v1010_v57 = vadd.f32 %v1009_v46, %v1008_v33 }
 0x1b9   :  { %v921_v37 = vpop.xlane.xlu0 %920 }
 0x1ba   :  { %v934_v3 = vadd.f32 %v921_v37, %v902_v43 }
 0x1bc   :  { %943 = vst.msk [vmem:[#allocation3 + $0x10] sm:$0xff] %vm2366_vm3, %v934_v3  ;;  %vm2382_vm3 = vmmov %vm2367_vm0 }
 0x1c3   :  { %v970_v34 = vld [vmem:[#allocation3 + $0x10] sm:$0xff] }
 0x1c4   :  { %v1002_v60 = vmul.f32 %v1517_v61, %v970_v34 }
 0x1c6   :  { %v1011_v40 = vsel %vm2367_vm0, %v1002_v60, 0.0 }
 0x1c7   :  { %v1012_v58 = vadd.f32 %v1011_v40, %v1010_v57 }
 0x1c9   :  { %v923_v29 = vpop.xlane.xlu2 %922 }
 0x1ca   :  { %v935_v13 = vadd.f32 %v923_v29, %v903_v0  ;;  %v1237_v29 = vld [vmem:[#allocation2 + $0x30] sm:$0xff] }
 0x1cc   :  { %944 = vst.msk [vmem:[#allocation3 + $0x18] sm:$0xff] %vm2368_vm7, %v935_v13 }
 0x1d3   :  { %v925_v27 = vpop.xlane.xlu1 %924  ;;  %v971_v50 = vld [vmem:[#allocation3 + $0x18] sm:$0xff] }
 0x1d4   :  { %v936_v53 = vadd.f32 %v925_v27, %v904_v49  ;;  %v1003_v15 = vmul.f32 %v1570_v23, %v971_v50  ;;  %v1047_v23 = vadd.f32 %v1046_v47, %v1045_v45 }
 0x1d6   :  { %945 = vst.msk [vmem:[#allocation3 + $0x20] sm:$0xff] %vm2369_vm4, %v936_v53  ;;  %v1013_v61 = vsel %vm2370_vm11, %v1003_v15, 0.0  ;;  %v1048_v31 = vrot.slane %v1047_v23, 1  ;;  %vm2383_vm4 = vmmov %vm2372_vm1 }
 0x1d7   :  { %v1014_v36 = vadd.f32 %v1013_v61, %v1012_v58 }
 0x1d8   :  { %v1049_v22 = vadd.f32 %v1048_v31, %v1047_v23 }
 0x1da   :  { %v2284_v44 = vmul.f32 0.0625, %v1049_v22 }
 0x1dc   :  { %v927_v5 = vpop.xlane.xlu2 %926  ;;  %v1052_v18 = vmax.f32 %v2284_v44, 1.0 }
 0x1dd   :  { %v937_v38 = vadd.f32 %v927_v5, %v905_v56  ;;  %v972_v6 = vld [vmem:[#allocation3 + $0x20] sm:$0xff] }
 0x1de   :  { %v1004_v32 = vmul.f32 %v1680_v12, %v972_v6  ;;  %1230 = vrcp.f32 %v1052_v18  ;;  %vm1058_vm0 = vweird.f32 %v1052_v18  ;;  %v1064_v27 = vand.u32 2147483648, %v1052_v18 }
 0x1df   :  { %946 = vst.msk [vmem:[#allocation3 + $0x28] sm:$0xff] %vm2371_vm14, %v937_v38 }
 0x1e0   :  { %v1015_v52 = vsel %vm2372_vm1, %v1004_v32, 0.0  ;;  %v1065_v53 = vor.u32 1.1754944e-38, %v1064_v27  ;;  %vm1051_vm1 = vcmp.gt.f32.partialorder %v2284_v44, 0.0 }
 0x1e1   :  { %v1016_v16 = vadd.f32 %v1015_v52, %v1014_v36  ;;  %v931_v1 = vpop.xlane.xlu1 %930 }
 0x1e2   :  { %v939_v24 = vadd.f32 %v931_v1, %v907_v42 }
 0x1e4   :  { %v370_v55 = vpop.xlane.xlu2 %369  ;;  %948 = vst.msk [vmem:[#allocation3 + $0x38] sm:$0xff] %vm2373_vm12, %v939_v24  ;;  %vm1069_vm12 = vcmask 0  }
 0x1e5   :  { %v951_v54 = vadd.f32 %v1232_v41, %v370_v55 }
 0x1e6   :  { %v973_v19 = vld [vmem:[#allocation3 + $0x28] sm:$0xff] }
 0x1e7   :  { %959 = vst.msk [vmem:[#allocation2 + $0x10] sm:$0xff] %vm2374_vm2, %v951_v54  ;;  %v1005_v12 = vmul.f32 %v1689_v63, %v973_v19  ;;  %v1231_v63 = vpop.eup %1230 }
 0x1e8   :  { %v1054_v14 = vmul.f32 %v1231_v63, %v1052_v18  ;;  %vm1059_vm7 = vweird.f32 %v1231_v63 }
 0x1e9   :  { %v1017_v28 = vsel %vm2375_vm5, %v1005_v12, 0.0  ;;  %v374_v2 = vpop.xlane.xlu1 %373  ;;  %vm1060_vm11 = vmor %vm1058_vm0, %vm1059_vm7 }
 0x1ea   :  { %v1018_v10 = vadd.f32 %v1017_v28, %v1016_v16  ;;  %v953_v11 = vadd.f32 %v1233_v62, %v374_v2  ;;  %v1055_v37 = vsub.f32 1.0, %v1054_v14 }
 0x1eb   :  { %v929_v7 = vpop.xlane.xlu0 %928  ;;  %v975_v8 = vld [vmem:[#allocation3 + $0x38] sm:$0xff] }
 0x1ec   :  { %v376_v39 = vpop.xlane.xlu2 %375  ;;  %v938_v9 = vadd.f32 %v929_v7, %v906_v30  ;;  %961 = vst.msk [vmem:[#allocation2 + $0x20] sm:$0xff] %vm2376_vm6, %v953_v11  ;;  %v1007_v57 = vmul.f32 %v1697_v21, %v975_v8  ;;  %v1056_v58 = vmul.f32 %v1231_v63, %v1055_v37  ;;  %v1062_v21 = vand.u32 2147483647, %v1052_v18 }
 0x1ed   :  { %v954_v17 = vadd.f32 %v1234_v51, %v376_v39 }
 0x1ee   :  { %947 = vst.msk [vmem:[#allocation3 + $0x30] sm:$0xff] %vm2377_vm8, %v938_v9  ;;  %v1021_v60 = vsel %vm2382_vm3, %v1007_v57, 0.0  ;;  %v1057_v50 = vadd.f32 %v1231_v63, %v1056_v58  ;;  %vm1063_vm14 = vcmp.eq.f32.partialorder %v1062_v21, 8.507059e+37 }
 0x1ef   :  { %962 = vst.msk [vmem:[#allocation2 + $0x28] sm:$0xff] %vm2378_vm9, %v954_v17 }
 0x1f0   :  { %v1061_v61 = vsel %vm1060_vm11, %v1231_v63, %v1057_v50 }
 0x1f1   :  { %v380_v26 = vpop.xlane.xlu1 %379  ;;  %v1066_v45 = vsel %vm1063_vm14, %v1065_v53, %v1061_v61 }
 0x1f2   :  { %v956_v20 = vadd.f32 %v1235_v59, %v380_v26 }
 0x1f3   :  { %v372_v48 = vpop.xlane.xlu0 %371 }
 0x1f4   :  { %v952_v33 = vadd.f32 %v1236_v35, %v372_v48  ;;  %964 = vst.msk [vmem:[#allocation2 + $0x38] sm:$0xff] %vm2379_vm10, %v956_v20 }
 0x1f5   :  { %v974_v46 = vld [vmem:[#allocation3 + $0x30] sm:$0xff] }
 0x1f6   :  { %960 = vst.msk [vmem:[#allocation2 + $0x18] sm:$0xff] %vm2380_vm15, %v952_v33  ;;  %v1006_v43 = vmul.f32 %v1703_v25, %v974_v46 }
 0x1f8   :  { %v1019_v3 = vsel %vm2381_vm13, %v1006_v43, 0.0 }
 0x1f9   :  { %v1020_v34 = vadd.f32 %v1019_v3, %v1018_v10 }
 0x1fb   :  { %v378_v0 = vpop.xlane.xlu0 %377  ;;  %v1022_v40 = vadd.f32 %v1021_v60, %v1020_v34 }
 0x1fc   :  { %v955_v13 = vadd.f32 %v1237_v29, %v378_v0 }
 0x1fd   :  { %v1023_v49 = vrot.slane %v1022_v40, 4 }
 0x1fe   :  { %963 = vst.msk [vmem:[#allocation2 + $0x30] sm:$0xff] %vm2383_vm4, %v955_v13 }
 0x1ff   :  { %v1024_v25 = vadd.f32 %v1023_v49, %v1022_v40 }
 0x201   :  { %v1025_v4 = vrot.slane %v1024_v25, 2 }
 0x203   :  { %v1026_v15 = vadd.f32 %v1025_v4, %v1024_v25 }
 0x205   :  { %v1027_v36 = vrot.slane %v1026_v15, 1 }
 0x207   :  { %v1028_v56 = vadd.f32 %v1027_v36, %v1026_v15 }
 0x209   :  { %v1067_v47 = vmul.f32 %v1066_v45, %v1028_v56 }
 0x20b   :  { %v1068_v5 = vsel %vm1051_vm1, %v1067_v47, 0.0 }
 0x20c   :  { %1070 = vst.msk [vmem:[#allocation7] sm:$0x1] %vm1069_vm12, %v1068_v5 }
 0x20d   :  { %1081 = dma.vmem_to_hbm [thread:$0]  %s1077_s21, 16, %s1079_s24, [#allocation6]  }
 0x20e   :  { %1288 = dma.done.wait [#allocation6], 16  }
 0x20f   :  { %1289 = vsyncadd [#allocation6], 4294967280 }
 0x210   :  { %1086 = vsyncpa [#allocation5], 1 }
 0x211   :  { %1087 = vsyncpa [#allocation6], 1 }

</bundles_post_ra>
